<compile_context>
chip_gen: v5e
topology: v5e:2x2
jax: 0.10.0
libtpu: 0.0.40
codegen_flags: <defaults>
</compile_context>

<pallas_src>
import jax
import jax.numpy as jnp
import numpy as np
from jax.experimental import pallas as pl
from jax.experimental.pallas import tpu as pltpu

HIDDEN_DIM = 64
INPUT_DIM = 1
NUM_LAYERS = 2   # kernel hard-codes the 2 stacked layers of the module
OUTPUT_DIM = 1


def lstm_kernel(x_ref, w0row_ref, brow_ref, wpack_ref, fcw_ref, fcb_ref,
                out_ref, add_ref):
    T, B, _ = x_ref.shape
    H = wpack_ref.shape[0] // 2
    G = 8 * H

    # ---- per-step gate addend, built once with VPU ops (no K=1 MXU matmul) -
    #   layer-0 columns: x[t] * W_ih0 + (b_ih0 + b_hh0)
    #   layer-1 columns: (b_ih1 + b_hh1)
    xw = x_ref[...] * w0row_ref[...] + brow_ref[...]            # (T, B, 8H)
    add_ref[pl.ds(0, T), :, :] = xw
    # Epilogue stage T only consumes the layer-1 columns (layer-0 result is
    # discarded), so a bias-only addend row is enough.
    add_ref[T] = jnp.broadcast_to(brow_ref[...], (B, G))
    # Prologue (stage 0): zero the layer-1 tanh-gate addend so layer-1 state
    # stays exactly zero through the first wavefront stage.
    add_ref[0, :, 7 * H:8 * H] = jnp.zeros((B, H), jnp.float32)

    def stage(s, carry):
        # Wavefront stage s: layer-0 step s and layer-1 step s-1, one fused
        # (B, 2H) @ (2H, 8H) bf16 matmul over block-structured weights.
        h_pack, c_pack = carry                     # [h0 | h1], [c0 | c1]
        g = jnp.dot(h_pack.astype(jnp.bfloat16), wpack_ref[...],
                    preferred_element_type=jnp.float32) + add_ref[s]
        sg = jax.nn.sigmoid(g[:, 0:6 * H])         # [i0 i1 f0 f1 o0 o1]
        gg = jnp.tanh(g[:, 6 * H:8 * H])           # [g0 g1]
        i_all = sg[:, 0:2 * H]
        f_all = sg[:, 2 * H:4 * H]
        o_all = sg[:, 4 * H:6 * H]
        c_new = f_all * c_pack + i_all * gg
        h_new = o_all * jnp.tanh(c_new)
        return h_new, c_new

    z = jnp.zeros((B, 2 * H), jnp.float32)
    h_pack, _ = jax.lax.fori_loop(0, T + 1, stage, (z, z), unroll=True)

    # out = fc(out[:, -1, :]) -> last hidden state of the top layer.
    # OUTPUT_DIM == 1, so use a VPU multiply + lane reduction (no N=1 matmul).
    h1 = h_pack[:, H:2 * H]
    out_ref[...] = (jnp.sum(h1 * fcw_ref[...], axis=-1, keepdims=True)
                    + fcb_ref[...])


@jax.jit
def lstm_forward(x, w0row, brow, wpack, fcw, fcb):
    """x: (B, T, D) float32, batch_first like the PyTorch module."""
    B, T, _ = x.shape
    x_tbd = jnp.transpose(x, (1, 0, 2))  # (T, B, D) time-major for the kernel
    return pl.pallas_call(
        lstm_kernel,
        out_shape=jax.ShapeDtypeStruct((B, OUTPUT_DIM), jnp.float32),
        in_specs=[pl.BlockSpec(memory_space=pltpu.MemorySpace.VMEM)] * 6,
        out_specs=pl.BlockSpec(memory_space=pltpu.MemorySpace.VMEM),
        scratch_shapes=[pltpu.VMEM((T + 1, B, 8 * HIDDEN_DIM), jnp.float32)],
    )(x_tbd, w0row, brow, wpack, fcw, fcb)
    # TODO(synk): for large B add a batch grid axis with
    # dimension_semantics=("parallel",) (v7x dual-TC) and size block-B against
    # v7x's 64 MiB VMEM / v5e's 16 MiB scoped default.


def make_params(key):
    """Deterministic init matching nn.LSTM / nn.Linear parameter shapes."""
    H, D = HIDDEN_DIM, INPUT_DIM
    bound = 1.0 / np.sqrt(H)
    ks = jax.random.split(key, 10)

    def u(k, shape):
        return jax.random.uniform(k, shape, jnp.float32, -bound, bound)

    # layer 0 (PyTorch gate row order i, f, g, o)
    W_ih0 = u(ks[0], (4 * H, D)); W_hh0 = u(ks[1], (4 * H, H))
    b_ih0 = u(ks[2], (4 * H,));   b_hh0 = u(ks[3], (4 * H,))
    # layer 1
    W_ih1 = u(ks[4], (4 * H, H)); W_hh1 = u(ks[5], (4 * H, H))
    b_ih1 = u(ks[6], (4 * H,));   b_hh1 = u(ks[7], (4 * H,))
    # fc
    fc_w = jax.random.uniform(ks[8], (OUTPUT_DIM, H), jnp.float32, -bound, bound)
    fc_b = jax.random.uniform(ks[9], (OUTPUT_DIM,), jnp.float32, -bound, bound)

    raw = (W_ih0, W_hh0, b_ih0, b_hh0, W_ih1, W_hh1, b_ih1, b_hh1, fc_w, fc_b)

    # ---- kernel packing -----------------------------------------------------
    # Packed 8H-wide gate column layout (all slices vreg/lane aligned):
    #   [ i0 | i1 | f0 | f1 | o0 | o1 | g0 | g1 ]  (each block H wide)
    def place(mat_t, layer):
        # mat_t: (K, 4H) with PyTorch gate column order [i, f, g, o].
        m = np.asarray(mat_t, np.float32)
        out = np.zeros((m.shape[0], 8 * H), np.float32)
        out[:, 0 * H + H * layer: 1 * H + H * layer] = m[:, 0 * H:1 * H]   # i
        out[:, 2 * H + H * layer: 3 * H + H * layer] = m[:, 1 * H:2 * H]   # f
        out[:, 4 * H + H * layer: 5 * H + H * layer] = m[:, 3 * H:4 * H]   # o
        out[:, 6 * H + H * layer: 7 * H + H * layer] = m[:, 2 * H:3 * H]   # g
        return out

    # Input-projection row (D == 1) and combined bias row, both (1, 8H).
    w0row = place(np.asarray(W_ih0).T, 0)
    brow = (place(np.asarray(b_ih0 + b_hh0)[None, :], 0)
            + place(np.asarray(b_ih1 + b_hh1)[None, :], 1))
    # Fused recurrent weight (2H, 8H): rows 0:H multiply h0, rows H:2H multiply
    # h1; layer-0 columns of the h1 rows stay zero (block structure).
    wpack = np.zeros((2 * H, 8 * H), np.float32)
    wpack[0:H] = place(np.asarray(W_hh0).T, 0) + place(np.asarray(W_ih1).T, 1)
    wpack[H:2 * H] = place(np.asarray(W_hh1).T, 1)

    kern = (jnp.asarray(w0row, jnp.float32),
            jnp.asarray(brow, jnp.float32),
            jnp.asarray(wpack, jnp.bfloat16),          # bf16 MXU operand
            jnp.asarray(fc_w, jnp.float32),            # (1, H) row, VPU reduce
            jnp.asarray(fc_b, jnp.float32).reshape(1, OUTPUT_DIM))
    return raw, kern


def ref_forward(x, raw):
    """Pure-JAX f32 reference mirroring torch nn.LSTM(batch_first=True) + Linear."""
    (W_ih0, W_hh0, b_ih0, b_hh0, W_ih1, W_hh1, b_ih1, b_hh1, fc_w, fc_b) = raw
    B, T, _ = x.shape
    H = HIDDEN_DIM
    h = [jnp.zeros((B, H)), jnp.zeros((B, H))]
    c = [jnp.zeros((B, H)), jnp.zeros((B, H))]
    Ws = [(W_ih0, W_hh0, b_ih0, b_hh0), (W_ih1, W_hh1, b_ih1, b_hh1)]
    for t in range(T):
        inp = x[:, t, :]
        for l in range(NUM_LAYERS):
            W_ih, W_hh, b_ih, b_hh = Ws[l]
            g = inp @ W_ih.T + h[l] @ W_hh.T + b_ih + b_hh
            i = jax.nn.sigmoid(g[:, 0:H])
            f = jax.nn.sigmoid(g[:, H:2 * H])
            gg = jnp.tanh(g[:, 2 * H:3 * H])
            o = jax.nn.sigmoid(g[:, 3 * H:4 * H])
            c[l] = f * c[l] + i * gg
            h[l] = o * jnp.tanh(c[l])
            inp = h[l]
    return h[-1] @ fc_w.T + fc_b


if __name__ == "__main__":
    B, T = 2, 8
    key = jax.random.PRNGKey(0)
    k_x, k_p = jax.random.split(key)
    x = jax.random.normal(k_x, (B, T, INPUT_DIM), jnp.float32)

    raw, kern = make_params(k_p)
    out = lstm_forward(x, *kern)
    out = jax.block_until_ready(out)

    ref = ref_forward(x, raw)
    assert out.shape == (B, OUTPUT_DIM)
    # bf16 MXU operands (f32 accumulation) -> relaxed tolerance vs f32 reference.
    np.testing.assert_allclose(np.asarray(out), np.asarray(ref),
                               rtol=5e-2, atol=5e-3)
    print("KERNEL_OK")
</pallas_src>

<mosaic_0001>
module attributes {stable_mosaic.version = 11 : i64} {
  func.func @lstm_kernel(%arg0: memref<8x2x1xf32, #tpu.memory_space<vmem>>, %arg1: memref<1x512xf32, #tpu.memory_space<vmem>>, %arg2: memref<1x512xf32, #tpu.memory_space<vmem>>, %arg3: memref<128x512xbf16, #tpu.memory_space<vmem>>, %arg4: memref<1x64xf32, #tpu.memory_space<vmem>>, %arg5: memref<1x1xf32, #tpu.memory_space<vmem>>, %arg6: memref<2x1xf32, #tpu.memory_space<vmem>>, %arg7: memref<9x2x512xf32, #tpu.memory_space<vmem>>) attributes {dimension_semantics = [], scalar_prefetch = 0 : i64, scratch_operands = 1 : i64, tpu.core_type = #tpu.core_type<tc>} {
    %c0 = arith.constant 0 : index
    %c0_0 = arith.constant 0 : index
    %c0_1 = arith.constant 0 : index
    %0 = vector.load %arg0[%c0, %c0_0, %c0_1] : memref<8x2x1xf32, #tpu.memory_space<vmem>>, vector<8x2x1xf32>
    %c0_2 = arith.constant 0 : index
    %c0_3 = arith.constant 0 : index
    %1 = vector.load %arg1[%c0_2, %c0_3] : memref<1x512xf32, #tpu.memory_space<vmem>>, vector<1x512xf32>
    %2 = vector.shape_cast %1 : vector<1x512xf32> to vector<1x1x512xf32>
    %3 = vector.broadcast %0 : vector<8x2x1xf32> to vector<8x2x512xf32>
    %4 = vector.broadcast %2 : vector<1x1x512xf32> to vector<8x2x512xf32>
    %5 = arith.mulf %3, %4 : vector<8x2x512xf32>
    %c0_4 = arith.constant 0 : index
    %c0_5 = arith.constant 0 : index
    %6 = vector.load %arg2[%c0_4, %c0_5] : memref<1x512xf32, #tpu.memory_space<vmem>>, vector<1x512xf32>
    %7 = vector.shape_cast %6 : vector<1x512xf32> to vector<1x1x512xf32>
    %8 = vector.broadcast %7 : vector<1x1x512xf32> to vector<8x2x512xf32>
    %9 = arith.addf %5, %8 : vector<8x2x512xf32>
    %c0_6 = arith.constant 0 : index
    %c0_7 = arith.constant 0 : index
    %c0_8 = arith.constant 0 : index
    %10 = vector.load %arg7[%c0_6, %c0_7, %c0_8] : memref<9x2x512xf32, #tpu.memory_space<vmem>>, vector<8x2x512xf32>
    tpu.vector_store %arg7[%c0_6, %c0_7, %c0_8], %9 {strides = array<i32>} : memref<9x2x512xf32, #tpu.memory_space<vmem>>, vector<8x2x512xf32>,
    %c0_9 = arith.constant 0 : index
    %c0_10 = arith.constant 0 : index
    %11 = vector.load %arg2[%c0_9, %c0_10] : memref<1x512xf32, #tpu.memory_space<vmem>>, vector<1x512xf32>
    %12 = vector.shape_cast %11 : vector<1x512xf32> to vector<1x512xf32>
    %13 = vector.broadcast %12 : vector<1x512xf32> to vector<2x512xf32>
    %c8 = arith.constant 8 : index
    %c0_11 = arith.constant 0 : index
    %c0_12 = arith.constant 0 : index
    %14 = vector.load %arg7[%c8, %c0_11, %c0_12] : memref<9x2x512xf32, #tpu.memory_space<vmem>>, vector<1x2x512xf32>
    %15 = vector.shape_cast %14 : vector<1x2x512xf32> to vector<2x512xf32>
    %16 = vector.shape_cast %13 : vector<2x512xf32> to vector<1x2x512xf32>
    tpu.vector_store %arg7[%c8, %c0_11, %c0_12], %16 {strides = array<i32>} : memref<9x2x512xf32, #tpu.memory_space<vmem>>, vector<1x2x512xf32>,
    %cst = arith.constant 0.000000e+00 : f32
    %17 = vector.broadcast %cst : f32 to vector<2x64xf32>
    %c0_13 = arith.constant 0 : index
    %c0_14 = arith.constant 0 : index
    %c448 = arith.constant 448 : index
    %18 = vector.load %arg7[%c0_13, %c0_14, %c448] : memref<9x2x512xf32, #tpu.memory_space<vmem>>, vector<1x2x64xf32>
    %19 = vector.shape_cast %18 : vector<1x2x64xf32> to vector<2x64xf32>
    %20 = vector.shape_cast %17 : vector<2x64xf32> to vector<1x2x64xf32>
    tpu.vector_store %arg7[%c0_13, %c0_14, %c448], %20 {strides = array<i32>} : memref<9x2x512xf32, #tpu.memory_space<vmem>>, vector<1x2x64xf32>,
    %cst_15 = arith.constant 0.000000e+00 : f32
    %21 = vector.broadcast %cst_15 : f32 to vector<2x128xf32>
    %c0_i32 = arith.constant 0 : i32
    %22 = arith.truncf %21 : vector<2x128xf32> to vector<2x128xbf16>
    %c0_16 = arith.constant 0 : index
    %c0_17 = arith.constant 0 : index
    %23 = vector.load %arg3[%c0_16, %c0_17] : memref<128x512xbf16, #tpu.memory_space<vmem>>, vector<128x512xbf16>
    %cst_18 = arith.constant dense<0.000000e+00> : vector<2x512xf32>
    %24 = tpu.matmul %22, %23, %cst_18 {dimension_numbers = #tpu.dot_dimension_numbers<[1], [0], [0], [1], [0, 0, 1, 1], [], []>} : vector<2x128xbf16>, vector<128x512xbf16>, vector<2x512xf32> -> vector<2x512xf32>
    %25 = arith.index_cast %c0_i32 : i32 to index
    %c0_19 = arith.constant 0 : index
    %c0_20 = arith.constant 0 : index
    %26 = vector.load %arg7[%25, %c0_19, %c0_20] : memref<9x2x512xf32, #tpu.memory_space<vmem>>, vector<1x2x512xf32>
    %27 = vector.shape_cast %26 : vector<1x2x512xf32> to vector<2x512xf32>
    %28 = arith.addf %24, %27 : vector<2x512xf32>
    %29 = vector.extract_strided_slice %28 {offsets = [0, 0], sizes = [2, 384], strides = [1, 1]} : vector<2x512xf32> to vector<2x384xf32>
    %30 = arith.negf %29 : vector<2x384xf32>
    %31 = math.exp %30 : vector<2x384xf32>
    %cst_21 = arith.constant 1.000000e+00 : f32
    %32 = vector.broadcast %cst_21 : f32 to vector<2x384xf32>
    %33 = arith.addf %32, %31 : vector<2x384xf32>
    %34 = arith.divf %32, %33 : vector<2x384xf32>
    %35 = vector.extract_strided_slice %28 {offsets = [0, 384], sizes = [2, 128], strides = [1, 1]} : vector<2x512xf32> to vector<2x128xf32>
    %36 = math.tanh %35 : vector<2x128xf32>
    %37 = vector.extract_strided_slice %34 {offsets = [0, 0], sizes = [2, 128], strides = [1, 1]} : vector<2x384xf32> to vector<2x128xf32>
    %38 = vector.extract_strided_slice %34 {offsets = [0, 128], sizes = [2, 128], strides = [1, 1]} : vector<2x384xf32> to vector<2x128xf32>
    %39 = vector.extract_strided_slice %34 {offsets = [0, 256], sizes = [2, 128], strides = [1, 1]} : vector<2x384xf32> to vector<2x128xf32>
    %40 = arith.mulf %38, %21 : vector<2x128xf32>
    %41 = arith.mulf %37, %36 : vector<2x128xf32>
    %42 = arith.addf %40, %41 : vector<2x128xf32>
    %43 = math.tanh %42 : vector<2x128xf32>
    %44 = arith.mulf %39, %43 : vector<2x128xf32>
    %c1_i32 = arith.constant 1 : i32
    %45 = arith.truncf %44 : vector<2x128xf32> to vector<2x128xbf16>
    %c0_22 = arith.constant 0 : index
    %c0_23 = arith.constant 0 : index
    %46 = vector.load %arg3[%c0_22, %c0_23] : memref<128x512xbf16, #tpu.memory_space<vmem>>, vector<128x512xbf16>
    %cst_24 = arith.constant dense<0.000000e+00> : vector<2x512xf32>
    %47 = tpu.matmul %45, %46, %cst_24 {dimension_numbers = #tpu.dot_dimension_numbers<[1], [0], [0], [1], [0, 0, 1, 1], [], []>} : vector<2x128xbf16>, vector<128x512xbf16>, vector<2x512xf32> -> vector<2x512xf32>
    %48 = arith.index_cast %c1_i32 : i32 to index
    %c0_25 = arith.constant 0 : index
    %c0_26 = arith.constant 0 : index
    %49 = vector.load %arg7[%48, %c0_25, %c0_26] : memref<9x2x512xf32, #tpu.memory_space<vmem>>, vector<1x2x512xf32>
    %50 = vector.shape_cast %49 : vector<1x2x512xf32> to vector<2x512xf32>
    %51 = arith.addf %47, %50 : vector<2x512xf32>
    %52 = vector.extract_strided_slice %51 {offsets = [0, 0], sizes = [2, 384], strides = [1, 1]} : vector<2x512xf32> to vector<2x384xf32>
    %53 = arith.negf %52 : vector<2x384xf32>
    %54 = math.exp %53 : vector<2x384xf32>
    %cst_27 = arith.constant 1.000000e+00 : f32
    %55 = vector.broadcast %cst_27 : f32 to vector<2x384xf32>
    %56 = arith.addf %55, %54 : vector<2x384xf32>
    %57 = arith.divf %55, %56 : vector<2x384xf32>
    %58 = vector.extract_strided_slice %51 {offsets = [0, 384], sizes = [2, 128], strides = [1, 1]} : vector<2x512xf32> to vector<2x128xf32>
    %59 = math.tanh %58 : vector<2x128xf32>
    %60 = vector.extract_strided_slice %57 {offsets = [0, 0], sizes = [2, 128], strides = [1, 1]} : vector<2x384xf32> to vector<2x128xf32>
    %61 = vector.extract_strided_slice %57 {offsets = [0, 128], sizes = [2, 128], strides = [1, 1]} : vector<2x384xf32> to vector<2x128xf32>
    %62 = vector.extract_strided_slice %57 {offsets = [0, 256], sizes = [2, 128], strides = [1, 1]} : vector<2x384xf32> to vector<2x128xf32>
    %63 = arith.mulf %61, %42 : vector<2x128xf32>
    %64 = arith.mulf %60, %59 : vector<2x128xf32>
    %65 = arith.addf %63, %64 : vector<2x128xf32>
    %66 = math.tanh %65 : vector<2x128xf32>
    %67 = arith.mulf %62, %66 : vector<2x128xf32>
    %c2_i32 = arith.constant 2 : i32
    %68 = arith.truncf %67 : vector<2x128xf32> to vector<2x128xbf16>
    %c0_28 = arith.constant 0 : index
    %c0_29 = arith.constant 0 : index
    %69 = vector.load %arg3[%c0_28, %c0_29] : memref<128x512xbf16, #tpu.memory_space<vmem>>, vector<128x512xbf16>
    %cst_30 = arith.constant dense<0.000000e+00> : vector<2x512xf32>
    %70 = tpu.matmul %68, %69, %cst_30 {dimension_numbers = #tpu.dot_dimension_numbers<[1], [0], [0], [1], [0, 0, 1, 1], [], []>} : vector<2x128xbf16>, vector<128x512xbf16>, vector<2x512xf32> -> vector<2x512xf32>
    %71 = arith.index_cast %c2_i32 : i32 to index
    %c0_31 = arith.constant 0 : index
    %c0_32 = arith.constant 0 : index
    %72 = vector.load %arg7[%71, %c0_31, %c0_32] : memref<9x2x512xf32, #tpu.memory_space<vmem>>, vector<1x2x512xf32>
    %73 = vector.shape_cast %72 : vector<1x2x512xf32> to vector<2x512xf32>
    %74 = arith.addf %70, %73 : vector<2x512xf32>
    %75 = vector.extract_strided_slice %74 {offsets = [0, 0], sizes = [2, 384], strides = [1, 1]} : vector<2x512xf32> to vector<2x384xf32>
    %76 = arith.negf %75 : vector<2x384xf32>
    %77 = math.exp %76 : vector<2x384xf32>
    %cst_33 = arith.constant 1.000000e+00 : f32
    %78 = vector.broadcast %cst_33 : f32 to vector<2x384xf32>
    %79 = arith.addf %78, %77 : vector<2x384xf32>
    %80 = arith.divf %78, %79 : vector<2x384xf32>
    %81 = vector.extract_strided_slice %74 {offsets = [0, 384], sizes = [2, 128], strides = [1, 1]} : vector<2x512xf32> to vector<2x128xf32>
    %82 = math.tanh %81 : vector<2x128xf32>
    %83 = vector.extract_strided_slice %80 {offsets = [0, 0], sizes = [2, 128], strides = [1, 1]} : vector<2x384xf32> to vector<2x128xf32>
    %84 = vector.extract_strided_slice %80 {offsets = [0, 128], sizes = [2, 128], strides = [1, 1]} : vector<2x384xf32> to vector<2x128xf32>
    %85 = vector.extract_strided_slice %80 {offsets = [0, 256], sizes = [2, 128], strides = [1, 1]} : vector<2x384xf32> to vector<2x128xf32>
    %86 = arith.mulf %84, %65 : vector<2x128xf32>
    %87 = arith.mulf %83, %82 : vector<2x128xf32>
    %88 = arith.addf %86, %87 : vector<2x128xf32>
    %89 = math.tanh %88 : vector<2x128xf32>
    %90 = arith.mulf %85, %89 : vector<2x128xf32>
    %c3_i32 = arith.constant 3 : i32
    %91 = arith.truncf %90 : vector<2x128xf32> to vector<2x128xbf16>
    %c0_34 = arith.constant 0 : index
    %c0_35 = arith.constant 0 : index
    %92 = vector.load %arg3[%c0_34, %c0_35] : memref<128x512xbf16, #tpu.memory_space<vmem>>, vector<128x512xbf16>
    %cst_36 = arith.constant dense<0.000000e+00> : vector<2x512xf32>
    %93 = tpu.matmul %91, %92, %cst_36 {dimension_numbers = #tpu.dot_dimension_numbers<[1], [0], [0], [1], [0, 0, 1, 1], [], []>} : vector<2x128xbf16>, vector<128x512xbf16>, vector<2x512xf32> -> vector<2x512xf32>
    %94 = arith.index_cast %c3_i32 : i32 to index
    %c0_37 = arith.constant 0 : index
    %c0_38 = arith.constant 0 : index
    %95 = vector.load %arg7[%94, %c0_37, %c0_38] : memref<9x2x512xf32, #tpu.memory_space<vmem>>, vector<1x2x512xf32>
    %96 = vector.shape_cast %95 : vector<1x2x512xf32> to vector<2x512xf32>
    %97 = arith.addf %93, %96 : vector<2x512xf32>
    %98 = vector.extract_strided_slice %97 {offsets = [0, 0], sizes = [2, 384], strides = [1, 1]} : vector<2x512xf32> to vector<2x384xf32>
    %99 = arith.negf %98 : vector<2x384xf32>
    %100 = math.exp %99 : vector<2x384xf32>
    %cst_39 = arith.constant 1.000000e+00 : f32
    %101 = vector.broadcast %cst_39 : f32 to vector<2x384xf32>
    %102 = arith.addf %101, %100 : vector<2x384xf32>
    %103 = arith.divf %101, %102 : vector<2x384xf32>
    %104 = vector.extract_strided_slice %97 {offsets = [0, 384], sizes = [2, 128], strides = [1, 1]} : vector<2x512xf32> to vector<2x128xf32>
    %105 = math.tanh %104 : vector<2x128xf32>
    %106 = vector.extract_strided_slice %103 {offsets = [0, 0], sizes = [2, 128], strides = [1, 1]} : vector<2x384xf32> to vector<2x128xf32>
    %107 = vector.extract_strided_slice %103 {offsets = [0, 128], sizes = [2, 128], strides = [1, 1]} : vector<2x384xf32> to vector<2x128xf32>
    %108 = vector.extract_strided_slice %103 {offsets = [0, 256], sizes = [2, 128], strides = [1, 1]} : vector<2x384xf32> to vector<2x128xf32>
    %109 = arith.mulf %107, %88 : vector<2x128xf32>
    %110 = arith.mulf %106, %105 : vector<2x128xf32>
    %111 = arith.addf %109, %110 : vector<2x128xf32>
    %112 = math.tanh %111 : vector<2x128xf32>
    %113 = arith.mulf %108, %112 : vector<2x128xf32>
    %c4_i32 = arith.constant 4 : i32
    %114 = arith.truncf %113 : vector<2x128xf32> to vector<2x128xbf16>
    %c0_40 = arith.constant 0 : index
    %c0_41 = arith.constant 0 : index
    %115 = vector.load %arg3[%c0_40, %c0_41] : memref<128x512xbf16, #tpu.memory_space<vmem>>, vector<128x512xbf16>
    %cst_42 = arith.constant dense<0.000000e+00> : vector<2x512xf32>
    %116 = tpu.matmul %114, %115, %cst_42 {dimension_numbers = #tpu.dot_dimension_numbers<[1], [0], [0], [1], [0, 0, 1, 1], [], []>} : vector<2x128xbf16>, vector<128x512xbf16>, vector<2x512xf32> -> vector<2x512xf32>
    %117 = arith.index_cast %c4_i32 : i32 to index
    %c0_43 = arith.constant 0 : index
    %c0_44 = arith.constant 0 : index
    %118 = vector.load %arg7[%117, %c0_43, %c0_44] : memref<9x2x512xf32, #tpu.memory_space<vmem>>, vector<1x2x512xf32>
    %119 = vector.shape_cast %118 : vector<1x2x512xf32> to vector<2x512xf32>
    %120 = arith.addf %116, %119 : vector<2x512xf32>
    %121 = vector.extract_strided_slice %120 {offsets = [0, 0], sizes = [2, 384], strides = [1, 1]} : vector<2x512xf32> to vector<2x384xf32>
    %122 = arith.negf %121 : vector<2x384xf32>
    %123 = math.exp %122 : vector<2x384xf32>
    %cst_45 = arith.constant 1.000000e+00 : f32
    %124 = vector.broadcast %cst_45 : f32 to vector<2x384xf32>
    %125 = arith.addf %124, %123 : vector<2x384xf32>
    %126 = arith.divf %124, %125 : vector<2x384xf32>
    %127 = vector.extract_strided_slice %120 {offsets = [0, 384], sizes = [2, 128], strides = [1, 1]} : vector<2x512xf32> to vector<2x128xf32>
    %128 = math.tanh %127 : vector<2x128xf32>
    %129 = vector.extract_strided_slice %126 {offsets = [0, 0], sizes = [2, 128], strides = [1, 1]} : vector<2x384xf32> to vector<2x128xf32>
    %130 = vector.extract_strided_slice %126 {offsets = [0, 128], sizes = [2, 128], strides = [1, 1]} : vector<2x384xf32> to vector<2x128xf32>
    %131 = vector.extract_strided_slice %126 {offsets = [0, 256], sizes = [2, 128], strides = [1, 1]} : vector<2x384xf32> to vector<2x128xf32>
    %132 = arith.mulf %130, %111 : vector<2x128xf32>
    %133 = arith.mulf %129, %128 : vector<2x128xf32>
    %134 = arith.addf %132, %133 : vector<2x128xf32>
    %135 = math.tanh %134 : vector<2x128xf32>
    %136 = arith.mulf %131, %135 : vector<2x128xf32>
    %c5_i32 = arith.constant 5 : i32
    %137 = arith.truncf %136 : vector<2x128xf32> to vector<2x128xbf16>
    %c0_46 = arith.constant 0 : index
    %c0_47 = arith.constant 0 : index
    %138 = vector.load %arg3[%c0_46, %c0_47] : memref<128x512xbf16, #tpu.memory_space<vmem>>, vector<128x512xbf16>
    %cst_48 = arith.constant dense<0.000000e+00> : vector<2x512xf32>
    %139 = tpu.matmul %137, %138, %cst_48 {dimension_numbers = #tpu.dot_dimension_numbers<[1], [0], [0], [1], [0, 0, 1, 1], [], []>} : vector<2x128xbf16>, vector<128x512xbf16>, vector<2x512xf32> -> vector<2x512xf32>
    %140 = arith.index_cast %c5_i32 : i32 to index
    %c0_49 = arith.constant 0 : index
    %c0_50 = arith.constant 0 : index
    %141 = vector.load %arg7[%140, %c0_49, %c0_50] : memref<9x2x512xf32, #tpu.memory_space<vmem>>, vector<1x2x512xf32>
    %142 = vector.shape_cast %141 : vector<1x2x512xf32> to vector<2x512xf32>
    %143 = arith.addf %139, %142 : vector<2x512xf32>
    %144 = vector.extract_strided_slice %143 {offsets = [0, 0], sizes = [2, 384], strides = [1, 1]} : vector<2x512xf32> to vector<2x384xf32>
    %145 = arith.negf %144 : vector<2x384xf32>
    %146 = math.exp %145 : vector<2x384xf32>
    %cst_51 = arith.constant 1.000000e+00 : f32
    %147 = vector.broadcast %cst_51 : f32 to vector<2x384xf32>
    %148 = arith.addf %147, %146 : vector<2x384xf32>
    %149 = arith.divf %147, %148 : vector<2x384xf32>
    %150 = vector.extract_strided_slice %143 {offsets = [0, 384], sizes = [2, 128], strides = [1, 1]} : vector<2x512xf32> to vector<2x128xf32>
    %151 = math.tanh %150 : vector<2x128xf32>
    %152 = vector.extract_strided_slice %149 {offsets = [0, 0], sizes = [2, 128], strides = [1, 1]} : vector<2x384xf32> to vector<2x128xf32>
    %153 = vector.extract_strided_slice %149 {offsets = [0, 128], sizes = [2, 128], strides = [1, 1]} : vector<2x384xf32> to vector<2x128xf32>
    %154 = vector.extract_strided_slice %149 {offsets = [0, 256], sizes = [2, 128], strides = [1, 1]} : vector<2x384xf32> to vector<2x128xf32>
    %155 = arith.mulf %153, %134 : vector<2x128xf32>
    %156 = arith.mulf %152, %151 : vector<2x128xf32>
    %157 = arith.addf %155, %156 : vector<2x128xf32>
    %158 = math.tanh %157 : vector<2x128xf32>
    %159 = arith.mulf %154, %158 : vector<2x128xf32>
    %c6_i32 = arith.constant 6 : i32
    %160 = arith.truncf %159 : vector<2x128xf32> to vector<2x128xbf16>
    %c0_52 = arith.constant 0 : index
    %c0_53 = arith.constant 0 : index
    %161 = vector.load %arg3[%c0_52, %c0_53] : memref<128x512xbf16, #tpu.memory_space<vmem>>, vector<128x512xbf16>
    %cst_54 = arith.constant dense<0.000000e+00> : vector<2x512xf32>
    %162 = tpu.matmul %160, %161, %cst_54 {dimension_numbers = #tpu.dot_dimension_numbers<[1], [0], [0], [1], [0, 0, 1, 1], [], []>} : vector<2x128xbf16>, vector<128x512xbf16>, vector<2x512xf32> -> vector<2x512xf32>
    %163 = arith.index_cast %c6_i32 : i32 to index
    %c0_55 = arith.constant 0 : index
    %c0_56 = arith.constant 0 : index
    %164 = vector.load %arg7[%163, %c0_55, %c0_56] : memref<9x2x512xf32, #tpu.memory_space<vmem>>, vector<1x2x512xf32>
    %165 = vector.shape_cast %164 : vector<1x2x512xf32> to vector<2x512xf32>
    %166 = arith.addf %162, %165 : vector<2x512xf32>
    %167 = vector.extract_strided_slice %166 {offsets = [0, 0], sizes = [2, 384], strides = [1, 1]} : vector<2x512xf32> to vector<2x384xf32>
    %168 = arith.negf %167 : vector<2x384xf32>
    %169 = math.exp %168 : vector<2x384xf32>
    %cst_57 = arith.constant 1.000000e+00 : f32
    %170 = vector.broadcast %cst_57 : f32 to vector<2x384xf32>
    %171 = arith.addf %170, %169 : vector<2x384xf32>
    %172 = arith.divf %170, %171 : vector<2x384xf32>
    %173 = vector.extract_strided_slice %166 {offsets = [0, 384], sizes = [2, 128], strides = [1, 1]} : vector<2x512xf32> to vector<2x128xf32>
    %174 = math.tanh %173 : vector<2x128xf32>
    %175 = vector.extract_strided_slice %172 {offsets = [0, 0], sizes = [2, 128], strides = [1, 1]} : vector<2x384xf32> to vector<2x128xf32>
    %176 = vector.extract_strided_slice %172 {offsets = [0, 128], sizes = [2, 128], strides = [1, 1]} : vector<2x384xf32> to vector<2x128xf32>
    %177 = vector.extract_strided_slice %172 {offsets = [0, 256], sizes = [2, 128], strides = [1, 1]} : vector<2x384xf32> to vector<2x128xf32>
    %178 = arith.mulf %176, %157 : vector<2x128xf32>
    %179 = arith.mulf %175, %174 : vector<2x128xf32>
    %180 = arith.addf %178, %179 : vector<2x128xf32>
    %181 = math.tanh %180 : vector<2x128xf32>
    %182 = arith.mulf %177, %181 : vector<2x128xf32>
    %c7_i32 = arith.constant 7 : i32
    %183 = arith.truncf %182 : vector<2x128xf32> to vector<2x128xbf16>
    %c0_58 = arith.constant 0 : index
    %c0_59 = arith.constant 0 : index
    %184 = vector.load %arg3[%c0_58, %c0_59] : memref<128x512xbf16, #tpu.memory_space<vmem>>, vector<128x512xbf16>
    %cst_60 = arith.constant dense<0.000000e+00> : vector<2x512xf32>
    %185 = tpu.matmul %183, %184, %cst_60 {dimension_numbers = #tpu.dot_dimension_numbers<[1], [0], [0], [1], [0, 0, 1, 1], [], []>} : vector<2x128xbf16>, vector<128x512xbf16>, vector<2x512xf32> -> vector<2x512xf32>
    %186 = arith.index_cast %c7_i32 : i32 to index
    %c0_61 = arith.constant 0 : index
    %c0_62 = arith.constant 0 : index
    %187 = vector.load %arg7[%186, %c0_61, %c0_62] : memref<9x2x512xf32, #tpu.memory_space<vmem>>, vector<1x2x512xf32>
    %188 = vector.shape_cast %187 : vector<1x2x512xf32> to vector<2x512xf32>
    %189 = arith.addf %185, %188 : vector<2x512xf32>
    %190 = vector.extract_strided_slice %189 {offsets = [0, 0], sizes = [2, 384], strides = [1, 1]} : vector<2x512xf32> to vector<2x384xf32>
    %191 = arith.negf %190 : vector<2x384xf32>
    %192 = math.exp %191 : vector<2x384xf32>
    %cst_63 = arith.constant 1.000000e+00 : f32
    %193 = vector.broadcast %cst_63 : f32 to vector<2x384xf32>
    %194 = arith.addf %193, %192 : vector<2x384xf32>
    %195 = arith.divf %193, %194 : vector<2x384xf32>
    %196 = vector.extract_strided_slice %189 {offsets = [0, 384], sizes = [2, 128], strides = [1, 1]} : vector<2x512xf32> to vector<2x128xf32>
    %197 = math.tanh %196 : vector<2x128xf32>
    %198 = vector.extract_strided_slice %195 {offsets = [0, 0], sizes = [2, 128], strides = [1, 1]} : vector<2x384xf32> to vector<2x128xf32>
    %199 = vector.extract_strided_slice %195 {offsets = [0, 128], sizes = [2, 128], strides = [1, 1]} : vector<2x384xf32> to vector<2x128xf32>
    %200 = vector.extract_strided_slice %195 {offsets = [0, 256], sizes = [2, 128], strides = [1, 1]} : vector<2x384xf32> to vector<2x128xf32>
    %201 = arith.mulf %199, %180 : vector<2x128xf32>
    %202 = arith.mulf %198, %197 : vector<2x128xf32>
    %203 = arith.addf %201, %202 : vector<2x128xf32>
    %204 = math.tanh %203 : vector<2x128xf32>
    %205 = arith.mulf %200, %204 : vector<2x128xf32>
    %c8_i32 = arith.constant 8 : i32
    %206 = arith.truncf %205 : vector<2x128xf32> to vector<2x128xbf16>
    %c0_64 = arith.constant 0 : index
    %c0_65 = arith.constant 0 : index
    %207 = vector.load %arg3[%c0_64, %c0_65] : memref<128x512xbf16, #tpu.memory_space<vmem>>, vector<128x512xbf16>
    %cst_66 = arith.constant dense<0.000000e+00> : vector<2x512xf32>
    %208 = tpu.matmul %206, %207, %cst_66 {dimension_numbers = #tpu.dot_dimension_numbers<[1], [0], [0], [1], [0, 0, 1, 1], [], []>} : vector<2x128xbf16>, vector<128x512xbf16>, vector<2x512xf32> -> vector<2x512xf32>
    %209 = arith.index_cast %c8_i32 : i32 to index
    %c0_67 = arith.constant 0 : index
    %c0_68 = arith.constant 0 : index
    %210 = vector.load %arg7[%209, %c0_67, %c0_68] : memref<9x2x512xf32, #tpu.memory_space<vmem>>, vector<1x2x512xf32>
    %211 = vector.shape_cast %210 : vector<1x2x512xf32> to vector<2x512xf32>
    %212 = arith.addf %208, %211 : vector<2x512xf32>
    %213 = vector.extract_strided_slice %212 {offsets = [0, 0], sizes = [2, 384], strides = [1, 1]} : vector<2x512xf32> to vector<2x384xf32>
    %214 = arith.negf %213 : vector<2x384xf32>
    %215 = math.exp %214 : vector<2x384xf32>
    %cst_69 = arith.constant 1.000000e+00 : f32
    %216 = vector.broadcast %cst_69 : f32 to vector<2x384xf32>
    %217 = arith.addf %216, %215 : vector<2x384xf32>
    %218 = arith.divf %216, %217 : vector<2x384xf32>
    %219 = vector.extract_strided_slice %212 {offsets = [0, 384], sizes = [2, 128], strides = [1, 1]} : vector<2x512xf32> to vector<2x128xf32>
    %220 = math.tanh %219 : vector<2x128xf32>
    %221 = vector.extract_strided_slice %218 {offsets = [0, 0], sizes = [2, 128], strides = [1, 1]} : vector<2x384xf32> to vector<2x128xf32>
    %222 = vector.extract_strided_slice %218 {offsets = [0, 128], sizes = [2, 128], strides = [1, 1]} : vector<2x384xf32> to vector<2x128xf32>
    %223 = vector.extract_strided_slice %218 {offsets = [0, 256], sizes = [2, 128], strides = [1, 1]} : vector<2x384xf32> to vector<2x128xf32>
    %224 = arith.mulf %222, %203 : vector<2x128xf32>
    %225 = arith.mulf %221, %220 : vector<2x128xf32>
    %226 = arith.addf %224, %225 : vector<2x128xf32>
    %227 = math.tanh %226 : vector<2x128xf32>
    %228 = arith.mulf %223, %227 : vector<2x128xf32>
    %c9_i32 = arith.constant 9 : i32
    %229 = vector.extract_strided_slice %228 {offsets = [0, 64], sizes = [2, 64], strides = [1, 1]} : vector<2x128xf32> to vector<2x64xf32>
    %c0_70 = arith.constant 0 : index
    %c0_71 = arith.constant 0 : index
    %230 = vector.load %arg4[%c0_70, %c0_71] : memref<1x64xf32, #tpu.memory_space<vmem>>, vector<1x64xf32>
    %231 = vector.broadcast %230 : vector<1x64xf32> to vector<2x64xf32>
    %232 = arith.mulf %229, %231 : vector<2x64xf32>
    %cst_72 = arith.constant dense<0.000000e+00> : vector<2xf32>
    %233 = vector.multi_reduction <add>, %232, %cst_72 [1] : vector<2x64xf32> to vector<2xf32>
    %234 = vector.shape_cast %233 : vector<2xf32> to vector<2x1xf32>
    %c0_73 = arith.constant 0 : index
    %c0_74 = arith.constant 0 : index
    %235 = vector.load %arg5[%c0_73, %c0_74] : memref<1x1xf32, #tpu.memory_space<vmem>>, vector<1x1xf32>
    %236 = vector.broadcast %235 : vector<1x1xf32> to vector<2x1xf32>
    %237 = arith.addf %234, %236 : vector<2x1xf32>
    %c0_75 = arith.constant 0 : index
    %c0_76 = arith.constant 0 : index
    %238 = vector.load %arg6[%c0_75, %c0_76] : memref<2x1xf32, #tpu.memory_space<vmem>>, vector<2x1xf32>
    tpu.vector_store %arg6[%c0_75, %c0_76], %237 {strides = array<i32>} : memref<2x1xf32, #tpu.memory_space<vmem>>, vector<2x1xf32>,
    return
  }
}

</mosaic_0001>

<bundles_post_ra>
// kernel: lstm_forward.1
= control target key start
LH: loop header
LB: loop body
LE: loop exit
PB: predicated region body
PF: predicated region fallthrough
CT: control target
= control target key end

     0   :  { %s2693_s0 = inlined_call_operand.vmem [shape: f32[8,2,1], index: 0, kind: input, shape index: {}]   ;;  %s2694_s1 = inlined_call_operand.vmem [shape: f32[1,512], index: 1, kind: input, shape index: {}]   ;;  %s2695_s2 = inlined_call_operand.vmem [shape: f32[1,512], index: 2, kind: input, shape index: {}]   ;;  %s2696_s3 = inlined_call_operand.hbm [shape: bf16[128,512], index: 3, kind: input, shape index: {}]   ;;  %s2697_s4 = inlined_call_operand.vmem [shape: f32[1,64], index: 4, kind: input, shape index: {}]   ;;  %s2698_s5 = inlined_call_operand.<no memory space> [shape: f32[1,1], index: 5, kind: input, shape index: {}]   ;;  %s2699_s6 = inlined_call_operand.vmem [shape: f32[2,1], index: 6, kind: output, shape index: {}]  }
   0x1   :  { %v11_v0 = vstv %s2698_s5 }
   0x2   :  { %12 = vst [vmem:[#allocation3] sm:$0x1] %v11_v0 }
   0x3   :  { %13 = vsyncpa [#allocation5], 0  ;;  %s24_s25 = sshll.u32 %s2696_s3, 4  ;;  %s2026_s26 = smov [#allocation4]   ;;  %s25_s25 = int_to_ptr.hbm [resolvable:$true] %s24_s25 }
   0x4   :  { %s26_s27 = sshll.u32 %s2026_s26, 4  ;;  %s2027_s28 = smov 256   ;;  %s27_s27 = int_to_ptr.vmem [resolvable:$true] %s26_s27 }
   0x5   :  { %s2028_s29 = smov 16  }
   0x6   :  { %32 = dma.hbm_to_vmem [thread:$0]  %s25_s25, 4096, %s27_s27, [#allocation5], %s2027_s28, %s2027_s28, %s2028_s29  }
   0x7   :  { %2024 = dma.done.wait [#allocation5], 4096  }
   0x8   :  { %2025 = vsyncadd [#allocation5], 4294963200  ;;  %v2029_v1 = vmov 0   ;;  %v42_v2 = vld [vmem:[%s2693_s0] sm:$0x3]  ;;  %vm230_vm0 = vcmask 1041408  }
   0x9   :  { %1851 = vset.pattern.permute.xlu0 %v2029_v1  ;;  %1852 = vset.pattern.permute.xlu1 %v2029_v1  ;;  %v1772_v3 = vld [vmem:[#allocation4 + $0xe0] sm:$0xf]  ;;  %v1843_v4 = vld [vmem:[#allocation4 + $0xec] sm:$0xf0]  ;;  %v1841_v6 = vld [vmem:[#allocation4 + $0xe4] sm:$0xf] }
   0xa   :  { %1853 = vset.pattern.permute.xlu2 %v2029_v1  ;;  %53 = vperm.xlu0 %1851, %v42_v2   ;;  %v2079_v5 = vor.u32 %v1843_v4, %v1772_v3  ;;  %v1774_v7 = vld [vmem:[#allocation4 + $0xf0] sm:$0xf0]  ;;  %v1780_v8 = vld [vmem:[#allocation4 + $0xe8] sm:$0xf]  ;;  %v1844_v10 = vld [vmem:[#allocation4 + $0xf4] sm:$0xf0] }
   0xb   :  { %v2081_v9 = vor.u32 %v1841_v6, %v1774_v7  ;;  %v1842_v11 = vld [vmem:[#allocation4 + $0xec] sm:$0xf]  ;;  %v1782_v12 = vld [vmem:[#allocation4 + $0xf8] sm:$0xf0]  ;;  %v2084_v13 = vor.u32 %v1844_v10, %v1780_v8  ;;  %v1756_v15 = vld [vmem:[#allocation4 + $0xc0] sm:$0xf] }
   0xc   :  { %493 = vmatpush.bf16.msra.mxu0 %v2079_v5  ;;  %v2086_v14 = vor.u32 %v1842_v11, %v1782_v12  ;;  %v1839_v16 = vld [vmem:[#allocation4 + $0xcc] sm:$0xf0]  ;;  %v1837_v17 = vld [vmem:[#allocation4 + $0xc4] sm:$0xf]  ;;  %v1758_v19 = vld [vmem:[#allocation4 + $0xd0] sm:$0xf0] }
   0xd   :  { %506 = vmatpush.bf16.msra.mxu1 %v2081_v9  ;;  %v2089_v18 = vor.u32 %v1839_v16, %v1756_v15  ;;  %v1764_v20 = vld [vmem:[#allocation4 + $0xc8] sm:$0xf]  ;;  %v1840_v21 = vld [vmem:[#allocation4 + $0xd4] sm:$0xf0]  ;;  %519 = vmatpush.bf16.msra.mxu2 %v2084_v13  ;;  %v2093_v22 = vor.u32 %v1837_v17, %v1758_v19  ;;  %v1838_v24 = vld [vmem:[#allocation4 + $0xcc] sm:$0xf] }
   0xe   :  { %532 = vmatpush.bf16.msra.mxu3 %v2086_v14  ;;  %v2095_v23 = vor.u32 %v1840_v21, %v1764_v20  ;;  %v1766_v25 = vld [vmem:[#allocation4 + $0xd8] sm:$0xf0]  ;;  %v43_v26 = vld [vmem:[%s2693_s0 + $0x2] sm:$0x3]  ;;  %v1740_v28 = vld [vmem:[#allocation4 + $0xa0] sm:$0xf] }
   0xf   :  { %v2100_v27 = vor.u32 %v1838_v24, %v1766_v25  ;;  %v1835_v29 = vld [vmem:[#allocation4 + $0xac] sm:$0xf0]  ;;  %v1833_v30 = vld [vmem:[#allocation4 + $0xa4] sm:$0xf]  ;;  %v1742_v32 = vld [vmem:[#allocation4 + $0xb0] sm:$0xf0] }
  0x10   :  { %494 = vmatpush.bf16.msra.mxu0 %v2089_v18  ;;  %v2103_v31 = vor.u32 %v1835_v29, %v1740_v28  ;;  %v1748_v33 = vld [vmem:[#allocation4 + $0xa8] sm:$0xf]  ;;  %v1836_v34 = vld [vmem:[#allocation4 + $0xb4] sm:$0xf0]  ;;  %v2106_v35 = vor.u32 %v1833_v30, %v1742_v32  ;;  %v1834_v36 = vld [vmem:[#allocation4 + $0xac] sm:$0xf] }
  0x11   :  { %507 = vmatpush.bf16.msra.mxu1 %v2093_v22  ;;  %v1750_v37 = vld [vmem:[#allocation4 + $0xb8] sm:$0xf0]  ;;  %v1724_v38 = vld [vmem:[#allocation4 + $0x80] sm:$0xf]  ;;  %520 = vmatpush.bf16.msra.mxu2 %v2095_v23  ;;  %v2110_v39 = vor.u32 %v1836_v34, %v1748_v33  ;;  %v1831_v41 = vld [vmem:[#allocation4 + $0x8c] sm:$0xf0] }
  0x12   :  { %533 = vmatpush.bf16.msra.mxu3 %v2100_v27  ;;  %v2112_v40 = vor.u32 %v1834_v36, %v1750_v37  ;;  %v1829_v42 = vld [vmem:[#allocation4 + $0x84] sm:$0xf]  ;;  %v1726_v43 = vld [vmem:[#allocation4 + $0x90] sm:$0xf0]  ;;  %58 = vperm.xlu0 %1851, %v43_v26   ;;  %v1732_v44 = vld [vmem:[#allocation4 + $0x88] sm:$0xf]  ;;  %v2115_v47 = vor.u32 %v1831_v41, %v1724_v38 }
  0x13   :  { %v1832_v45 = vld [vmem:[#allocation4 + $0x94] sm:$0xf0]  ;;  %v1830_v46 = vld [vmem:[#allocation4 + $0x8c] sm:$0xf]  ;;  %v1734_v48 = vld [vmem:[#allocation4 + $0x98] sm:$0xf0]  ;;  %v2121_v50 = vor.u32 %v1829_v42, %v1726_v43 }
  0x14   :  { %495 = vmatpush.bf16.msra.mxu0 %v2103_v31  ;;  %v44_v49 = vld [vmem:[%s2693_s0 + $0x4] sm:$0x3]  ;;  %v1708_v51 = vld [vmem:[#allocation4 + $0x60] sm:$0xf]  ;;  %v2125_v53 = vor.u32 %v1832_v45, %v1732_v44  ;;  %v2127_v54 = vor.u32 %v1830_v46, %v1734_v48  ;;  %v1825_v55 = vld [vmem:[#allocation4 + $0x64] sm:$0xf] }
  0x15   :  { %508 = vmatpush.bf16.msra.mxu1 %v2106_v35  ;;  %63 = vperm.xlu1 %1852, %v44_v49   ;;  %v1827_v52 = vld [vmem:[#allocation4 + $0x6c] sm:$0xf0]  ;;  %v1710_v56 = vld [vmem:[#allocation4 + $0x70] sm:$0xf0]  ;;  %v1716_v57 = vld [vmem:[#allocation4 + $0x68] sm:$0xf] }
  0x16   :  { %521 = vmatpush.bf16.msra.mxu2 %v2110_v39  ;;  %534 = vmatpush.bf16.msra.mxu3 %v2112_v40  ;;  %v1828_v58 = vld [vmem:[#allocation4 + $0x74] sm:$0xf0]  ;;  %v1826_v59 = vld [vmem:[#allocation4 + $0x6c] sm:$0xf]  ;;  %v1718_v60 = vld [vmem:[#allocation4 + $0x78] sm:$0xf0]  ;;  %v2133_v62 = vor.u32 %v1827_v52, %v1708_v51  ;;  %v2136_v63 = vor.u32 %v1825_v55, %v1710_v56 }
  0x17   :  { %v48_v61 = vld [vmem:[%s2693_s0 + $0xc] sm:$0x3]  ;;  %v1692_v0 = vld [vmem:[#allocation4 + $0x40] sm:$0xf]  ;;  %v1823_v2 = vld [vmem:[#allocation4 + $0x4c] sm:$0xf0]  ;;  %v2140_v4 = vor.u32 %v1828_v58, %v1716_v57  ;;  %v2142_v6 = vor.u32 %v1826_v59, %v1718_v60 }
  0x18   :  { %496 = vmatpush.bf16.msra.mxu0 %v2115_v47  ;;  %v1821_v3 = vld [vmem:[#allocation4 + $0x44] sm:$0xf]  ;;  %v1694_v7 = vld [vmem:[#allocation4 + $0x50] sm:$0xf0]  ;;  %v1700_v8 = vld [vmem:[#allocation4 + $0x48] sm:$0xf]  ;;  %v2148_v16 = vor.u32 %v1823_v2, %v1692_v0 }
  0x19   :  { %509 = vmatpush.bf16.msra.mxu1 %v2121_v50  ;;  %v45_v10 = vld [vmem:[%s2693_s0 + $0x6] sm:$0x3]  ;;  %v1824_v11 = vld [vmem:[#allocation4 + $0x54] sm:$0xf0]  ;;  %v1822_v12 = vld [vmem:[#allocation4 + $0x4c] sm:$0xf]  ;;  %v2151_v17 = vor.u32 %v1821_v3, %v1694_v7 }
  0x1a   :  { %522 = vmatpush.bf16.msra.mxu2 %v2125_v53  ;;  %535 = vmatpush.bf16.msra.mxu3 %v2127_v54  ;;  %v1702_v15 = vld [vmem:[#allocation4 + $0x58] sm:$0xf0]  ;;  %v1676_v19 = vld [vmem:[#allocation4 + $0x20] sm:$0xf]  ;;  %v1819_v20 = vld [vmem:[#allocation4 + $0x2c] sm:$0xf0]  ;;  %v2155_v21 = vor.u32 %v1824_v11, %v1700_v8 }
  0x1b   :  { %83 = vperm.xlu0 %1851, %v48_v61   ;;  %v2157_v24 = vor.u32 %v1822_v12, %v1702_v15  ;;  %v1817_v25 = vld [vmem:[#allocation4 + $0x24] sm:$0xf]  ;;  %v1678_v26 = vld [vmem:[#allocation4 + $0x30] sm:$0xf0]  ;;  %v1684_v28 = vld [vmem:[#allocation4 + $0x28] sm:$0xf]  ;;  %v2160_v33 = vor.u32 %v1819_v20, %v1676_v19 }
  0x1c   :  { %497 = vmatpush.bf16.msra.mxu0 %v2133_v62  ;;  %v1820_v29 = vld [vmem:[#allocation4 + $0x34] sm:$0xf0]  ;;  %v1818_v30 = vld [vmem:[#allocation4 + $0x2c] sm:$0xf]  ;;  %v1686_v32 = vld [vmem:[#allocation4 + $0x38] sm:$0xf0]  ;;  %v2166_v37 = vor.u32 %v1817_v25, %v1678_v26 }
  0x1d   :  { %510 = vmatpush.bf16.msra.mxu1 %v2136_v63  ;;  %68 = vperm.xlu1 %1852, %v45_v10   ;;  %v1660_v34 = vld [vmem:[#allocation4] sm:$0xf]  ;;  %v46_v36 = vld [vmem:[%s2693_s0 + $0x8] sm:$0x3]  ;;  %v1815_v38 = vld [vmem:[#allocation4 + $0xc] sm:$0xf0]  ;;  %v2170_v43 = vor.u32 %v1820_v29, %v1684_v28  ;;  %v2172_v44 = vor.u32 %v1818_v30, %v1686_v32 }
  0x1e   :  { %523 = vmatpush.bf16.msra.mxu2 %v2140_v4  ;;  %536 = vmatpush.bf16.msra.mxu3 %v2142_v6  ;;  %v1813_v41 = vld [vmem:[#allocation4 + $0x4] sm:$0xf]  ;;  %v1662_v42 = vld [vmem:[#allocation4 + $0x10] sm:$0xf0]  ;;  %v1668_v45 = vld [vmem:[#allocation4 + $0x8] sm:$0xf]  ;;  %v2175_v51 = vor.u32 %v1815_v38, %v1660_v34 }
  0x1f   :  { %73 = vperm.xlu2 %1853, %v46_v36   ;;  %v1816_v46 = vld [vmem:[#allocation4 + $0x14] sm:$0xf0]  ;;  %v1814_v48 = vld [vmem:[#allocation4 + $0xc] sm:$0xf]  ;;  %v1670_v49 = vld [vmem:[#allocation4 + $0x18] sm:$0xf0]  ;;  %v2178_v52 = vor.u32 %v1813_v41, %v1662_v42 }
  0x20   :  { %498 = vmatpush.bf16.msra.mxu0 %v2148_v16  ;;  %v2182_v55 = vor.u32 %v1816_v46, %v1668_v45  ;;  %v2184_v56 = vor.u32 %v1814_v48, %v1670_v49  ;;  %v47_v57 = vld [vmem:[%s2693_s0 + $0xa] sm:$0x3]  ;;  %v132_v58 = vld [vmem:[%s2695_s2] sm:$0xf]  ;;  %vm232_vm1 = vcmask 1045508   ;;  %vm234_vm2 = vcmask 1043456  }
  0x21   :  { %511 = vmatpush.bf16.msra.mxu1 %v2151_v17  ;;  %2708 = vst [vmem:[#allocation7_spill] sm:$0xff] %v2178_v52  ;;  %v2275_v2 = vperm.slane %v132_v58, 0  ;;  %v2277_v3 = vperm.slane %v132_v58, 1  ;;  %v2279_v7 = vperm.slane %v132_v58, 2  ;;  %v2281_v8 = vperm.slane %v132_v58, 3  ;;  %s2031_s26 = smov 64  }
  0x22   :  { %524 = vmatpush.bf16.msra.mxu2 %v2155_v21  ;;  %537 = vmatpush.bf16.msra.mxu3 %v2157_v24  ;;  %2709 = vst [vmem:[#allocation8_spill] sm:$0xff] %v2182_v55  ;;  %vm288_vm3 = vcmask 1041920  }
  0x23   :  { %2710 = vst [vmem:[#allocation9_spill] sm:$0xff] %v2184_v56 }
  0x24   :  { %499 = vmatpush.bf16.msra.mxu0 %v2160_v33  ;;  %2711 = vst [vmem:[#allocation10_spill] sm:$0xff] %v2279_v7 }
  0x25   :  { %512 = vmatpush.bf16.msra.mxu1 %v2166_v37  ;;  %2712 = vst [vmem:[#allocation11_spill] sm:$0xff] %v2281_v8 }
  0x26   :  { %525 = vmatpush.bf16.msra.mxu2 %v2170_v43  ;;  %538 = vmatpush.bf16.msra.mxu3 %v2172_v44 }
  0x27   :  { %78 = vperm.xlu2 %1853, %v47_v57  }
  0x28   :  { %500 = vmatpush.bf16.msra.mxu0 %v2175_v51 }
  0x29   :  { %513 = vmatpush.bf16.msra.mxu1 %v2178_v52 }
  0x2a   :  { %526 = vmatpush.bf16.msra.mxu2 %v2182_v55  ;;  %539 = vmatpush.bf16.msra.mxu3 %v2184_v56 }
  0x2b   :  { %501 = vmatmul.bf16.vlgmr.msra.gmra.mxu0 %v2029_v1 }
  0x2c   :  { %514 = vmatmul.bf16.vlgmr.msra.gmra.mxu1 %v2029_v1  ;;  %621 = vmatpush.bf16.msrb.mxu0 %v2079_v5 }
  0x2d   :  { %634 = vmatpush.bf16.msrb.mxu1 %v2081_v9  ;;  %527 = vmatmul.bf16.vlgmr.msra.gmra.mxu2 %v2029_v1 }
  0x2e   :  { %540 = vmatmul.bf16.vlgmr.msra.gmra.mxu3 %v2029_v1  ;;  %647 = vmatpush.bf16.msrb.mxu2 %v2084_v13  ;;  %v50_v1 = vld [vmem:[%s2694_s1] sm:$0xf] }
  0x2f   :  { %660 = vmatpush.bf16.msrb.mxu3 %v2086_v14  ;;  %v2267_v59 = vperm.slane %v50_v1, 0  ;;  %v2269_v60 = vperm.slane %v50_v1, 1  ;;  %v2271_v61 = vperm.slane %v50_v1, 2  ;;  %v2273_v0 = vperm.slane %v50_v1, 3 }
  0x30   :  { %622 = vmatpush.bf16.msrb.mxu0 %v2089_v18 }
  0x31   :  { %635 = vmatpush.bf16.msrb.mxu1 %v2093_v22 }
  0x32   :  { %648 = vmatpush.bf16.msrb.mxu2 %v2095_v23 }
  0x33   :  { %661 = vmatpush.bf16.msrb.mxu3 %v2100_v27 }
  0x34   :  { %623 = vmatpush.bf16.msrb.mxu0 %v2103_v31 }
  0x35   :  { %636 = vmatpush.bf16.msrb.mxu1 %v2106_v35 }
  0x36   :  { %649 = vmatpush.bf16.msrb.mxu2 %v2110_v39 }
  0x37   :  { %662 = vmatpush.bf16.msrb.mxu3 %v2112_v40 }
  0x38   :  { %624 = vmatpush.bf16.msrb.mxu0 %v2115_v47 }
  0x39   :  { %637 = vmatpush.bf16.msrb.mxu1 %v2121_v50 }
  0x3a   :  { %650 = vmatpush.bf16.msrb.mxu2 %v2125_v53 }
  0x3b   :  { %663 = vmatpush.bf16.msrb.mxu3 %v2127_v54 }
  0x3c   :  { %625 = vmatpush.bf16.msrb.mxu0 %v2133_v62 }
  0x3d   :  { %638 = vmatpush.bf16.msrb.mxu1 %v2136_v63 }
  0x3e   :  { %651 = vmatpush.bf16.msrb.mxu2 %v2140_v4 }
  0x3f   :  { %664 = vmatpush.bf16.msrb.mxu3 %v2142_v6 }
  0x40   :  { %626 = vmatpush.bf16.msrb.mxu0 %v2148_v16 }
  0x41   :  { %639 = vmatpush.bf16.msrb.mxu1 %v2151_v17 }
  0x42   :  { %652 = vmatpush.bf16.msrb.mxu2 %v2155_v21 }
  0x43   :  { %665 = vmatpush.bf16.msrb.mxu3 %v2157_v24 }
  0x44   :  { %627 = vmatpush.bf16.msrb.mxu0 %v2160_v33 }
  0x45   :  { %640 = vmatpush.bf16.msrb.mxu1 %v2166_v37 }
  0x46   :  { %653 = vmatpush.bf16.msrb.mxu2 %v2170_v43 }
  0x47   :  { %666 = vmatpush.bf16.msrb.mxu3 %v2172_v44 }
  0x48   :  { %628 = vmatpush.bf16.msrb.mxu0 %v2175_v51 }
  0x49   :  { %641 = vmatpush.bf16.msrb.mxu1 %v2178_v52 }
  0x4a   :  { %654 = vmatpush.bf16.msrb.mxu2 %v2182_v55 }
  0x4b   :  { %667 = vmatpush.bf16.msrb.mxu3 %v2184_v56 }
  0x4c   :  { %749 = vmatpush.bf16.msra.mxu0 %v2079_v5 }
  0x4d   :  { %762 = vmatpush.bf16.msra.mxu1 %v2081_v9 }
  0x4e   :  { %775 = vmatpush.bf16.msra.mxu2 %v2084_v13 }
  0x4f   :  { %788 = vmatpush.bf16.msra.mxu3 %v2086_v14 }
  0x50   :  { %750 = vmatpush.bf16.msra.mxu0 %v2089_v18 }
  0x51   :  { %763 = vmatpush.bf16.msra.mxu1 %v2093_v22 }
  0x52   :  { %776 = vmatpush.bf16.msra.mxu2 %v2095_v23 }
  0x53   :  { %789 = vmatpush.bf16.msra.mxu3 %v2100_v27 }
  0x54   :  { %751 = vmatpush.bf16.msra.mxu0 %v2103_v31 }
  0x55   :  { %764 = vmatpush.bf16.msra.mxu1 %v2106_v35 }
  0x56   :  { %777 = vmatpush.bf16.msra.mxu2 %v2110_v39 }
  0x57   :  { %790 = vmatpush.bf16.msra.mxu3 %v2112_v40 }
  0x58   :  { %752 = vmatpush.bf16.msra.mxu0 %v2115_v47 }
  0x59   :  { %765 = vmatpush.bf16.msra.mxu1 %v2121_v50 }
  0x5a   :  { %778 = vmatpush.bf16.msra.mxu2 %v2125_v53 }
  0x5b   :  { %791 = vmatpush.bf16.msra.mxu3 %v2127_v54 }
  0x5c   :  { %753 = vmatpush.bf16.msra.mxu0 %v2133_v62 }
  0x5d   :  { %766 = vmatpush.bf16.msra.mxu1 %v2136_v63 }
  0x5e   :  { %779 = vmatpush.bf16.msra.mxu2 %v2140_v4 }
  0x5f   :  { %792 = vmatpush.bf16.msra.mxu3 %v2142_v6 }
  0x60   :  { %754 = vmatpush.bf16.msra.mxu0 %v2148_v16 }
  0x61   :  { %767 = vmatpush.bf16.msra.mxu1 %v2151_v17 }
  0x62   :  { %780 = vmatpush.bf16.msra.mxu2 %v2155_v21 }
  0x63   :  { %793 = vmatpush.bf16.msra.mxu3 %v2157_v24 }
  0x64   :  { %755 = vmatpush.bf16.msra.mxu0 %v2160_v33 }
  0x65   :  { %768 = vmatpush.bf16.msra.mxu1 %v2166_v37 }
  0x66   :  { %781 = vmatpush.bf16.msra.mxu2 %v2170_v43 }
  0x67   :  { %794 = vmatpush.bf16.msra.mxu3 %v2172_v44 }
  0x68   :  { %756 = vmatpush.bf16.msra.mxu0 %v2175_v51 }
  0x69   :  { %769 = vmatpush.bf16.msra.mxu1 %v2178_v52 }
  0x6a   :  { %782 = vmatpush.bf16.msra.mxu2 %v2182_v55 }
  0x6b   :  { %795 = vmatpush.bf16.msra.mxu3 %v2184_v56 }
  0x79   :  { %v74_v10 = vpop.permute.xlu2 %73 }
  0x7a   :  { %v116_v12 = vmul.f32 %v2267_v59, %v74_v10  ;;  %v117_v15 = vmul.f32 %v2269_v60, %v74_v10  ;;  %v118_v19 = vmul.f32 %v2271_v61, %v74_v10  ;;  %v119_v20 = vmul.f32 %v2273_v0, %v74_v10 }
  0x7c   :  { %v54_v11 = vpop.permute.xlu0 %53  ;;  %v158_v30 = vadd.f32 %v2275_v2, %v116_v12  ;;  %v159_v32 = vadd.f32 %v2277_v3, %v117_v15  ;;  %v160_v34 = vadd.f32 %v2279_v7, %v118_v19  ;;  %v161_v36 = vadd.f32 %v2281_v8, %v119_v20 }
  0x7d   :  { %v100_v25 = vmul.f32 %v2267_v59, %v54_v11  ;;  %v101_v26 = vmul.f32 %v2269_v60, %v54_v11  ;;  %v102_v28 = vmul.f32 %v2271_v61, %v54_v11  ;;  %v103_v29 = vmul.f32 %v2273_v0, %v54_v11 }
  0x7e   :  { %v218_v46 = vrot.slane %v159_v32, 6  ;;  %v219_v48 = vrot.slane %v160_v34, 4  ;;  %v220_v49 = vrot.slane %v161_v36, 2  ;;  %v2030_v34 = vmov 0.0  }
  0x7f   :  { %v142_v38 = vadd.f32 %v2275_v2, %v100_v25  ;;  %v143_v41 = vadd.f32 %v2277_v3, %v101_v26  ;;  %v144_v42 = vadd.f32 %v2279_v7, %v102_v28  ;;  %v145_v45 = vadd.f32 %v2281_v8, %v103_v29 }
  0x80   :  { %v245_v10 = vsel %vm230_vm0, %v158_v30, %v218_v46  ;;  %v246_v11 = vsel %vm232_vm1, %v219_v48, %v220_v49 }
  0x81   :  { %v206_v57 = vrot.slane %v143_v41, 6  ;;  %v207_v1 = vrot.slane %v144_v42, 4  ;;  %v208_v58 = vrot.slane %v145_v45, 2  ;;  %v2304_v19 = vsel %vm234_vm2, %v245_v10, %v246_v11  ;;  %v79_v20 = vpop.permute.xlu2 %78 }
  0x82   :  { %v120_v26 = vmul.f32 %v2267_v59, %v79_v20  ;;  %v121_v28 = vmul.f32 %v2269_v60, %v79_v20  ;;  %v122_v29 = vmul.f32 %v2271_v61, %v79_v20  ;;  %v123_v32 = vmul.f32 %v2273_v0, %v79_v20 }
  0x83   :  { %v231_v12 = vsel %vm230_vm0, %v142_v38, %v206_v57  ;;  %v233_v15 = vsel %vm232_vm1, %v207_v1, %v208_v58 }
  0x84   :  { %v235_v25 = vsel %vm234_vm2, %v231_v12, %v233_v15  ;;  %v59_v30 = vpop.permute.xlu0 %58  ;;  %v162_v46 = vadd.f32 %v2275_v2, %v120_v26  ;;  %v163_v48 = vadd.f32 %v2277_v3, %v121_v28  ;;  %v164_v49 = vadd.f32 %v2279_v7, %v122_v29 }
  0x85   :  { %265 = vst [vmem:[#allocation2] sm:$0xff] %v235_v25  ;;  %v104_v36 = vmul.f32 %v2267_v59, %v59_v30  ;;  %v105_v38 = vmul.f32 %v2269_v60, %v59_v30  ;;  %v106_v41 = vmul.f32 %v2271_v61, %v59_v30  ;;  %v107_v42 = vmul.f32 %v2273_v0, %v59_v30 }
  0x86   :  { %289 = vst.msk [vmem:[#allocation2 + $0x6] sm:$0x3] %vm288_vm3, %v2030_v34  ;;  %v165_v57 = vadd.f32 %v2281_v8, %v123_v32  ;;  %v221_v30 = vrot.slane %v163_v48, 6  ;;  %v222_v56 = vrot.slane %v164_v49, 4 }
  0x87   :  { %v64_v45 = vpop.permute.xlu1 %63  ;;  %v146_v1 = vadd.f32 %v2275_v2, %v104_v36  ;;  %v147_v58 = vadd.f32 %v2277_v3, %v105_v38  ;;  %v148_v10 = vadd.f32 %v2279_v7, %v106_v41  ;;  %v149_v11 = vadd.f32 %v2281_v8, %v107_v42 }
  0x88   :  { %v108_v12 = vmul.f32 %v2267_v59, %v64_v45  ;;  %v109_v15 = vmul.f32 %v2269_v60, %v64_v45  ;;  %v110_v20 = vmul.f32 %v2271_v61, %v64_v45  ;;  %v111_v25 = vmul.f32 %v2273_v0, %v64_v45 }
  0x89   :  { %v209_v26 = vrot.slane %v147_v58, 6  ;;  %v210_v28 = vrot.slane %v148_v10, 4  ;;  %v211_v29 = vrot.slane %v149_v11, 2  ;;  %v223_v55 = vrot.slane %v165_v57, 2 }
  0x8a   :  { %v150_v32 = vadd.f32 %v2275_v2, %v108_v12  ;;  %v151_v34 = vadd.f32 %v2277_v3, %v109_v15  ;;  %v152_v36 = vadd.f32 %v2279_v7, %v110_v20  ;;  %v153_v38 = vadd.f32 %v2281_v8, %v111_v25 }
  0x8b   :  { %v236_v41 = vsel %vm230_vm0, %v146_v1, %v209_v26  ;;  %v237_v42 = vsel %vm232_vm1, %v210_v28, %v211_v29  ;;  %v248_v26 = vsel %vm230_vm0, %v162_v46, %v221_v30  ;;  %v249_v28 = vsel %vm232_vm1, %v222_v56, %v223_v55 }
  0x8c   :  { %v238_v45 = vsel %vm234_vm2, %v236_v41, %v237_v42  ;;  %v212_v58 = vrot.slane %v151_v34, 6  ;;  %v213_v10 = vrot.slane %v152_v36, 4  ;;  %v214_v48 = vrot.slane %v153_v38, 2 }
  0x8d   :  { %v322_v52 = vld [vmem:[#allocation2] sm:$0xff]  ;;  %v84_v11 = vpop.permute.xlu0 %83  ;;  %v2352_v56 = vsel %vm234_vm2, %v248_v26, %v249_v28 }
  0x8e   :  { %484 = vst [vmem:[#allocation1] ss:$4 sm:$0xff] %v322_v52  ;;  %v124_v12 = vmul.f32 %v2267_v59, %v84_v11  ;;  %v125_v15 = vmul.f32 %v2269_v60, %v84_v11  ;;  %v126_v20 = vmul.f32 %v2271_v61, %v84_v11  ;;  %v127_v1 = vmul.f32 %v2273_v0, %v84_v11 }
  0x8f   :  { %v239_v25 = vsel %vm230_vm0, %v150_v32, %v212_v58  ;;  %v240_v49 = vsel %vm232_vm1, %v213_v10, %v214_v48  ;;  %v69_v57 = vpop.permute.xlu1 %68 }
  0x90   :  { %v241_v29 = vsel %vm234_vm2, %v239_v25, %v240_v49  ;;  %v166_v52 = vadd.f32 %v2275_v2, %v124_v12  ;;  %v167_v34 = vadd.f32 %v2277_v3, %v125_v15  ;;  %v168_v36 = vadd.f32 %v2279_v7, %v126_v20 }
  0x91   :  { %v169_v38 = vadd.f32 %v2281_v8, %v127_v1  ;;  %v112_v41 = vmul.f32 %v2267_v59, %v69_v57  ;;  %v113_v32 = vmul.f32 %v2269_v60, %v69_v57  ;;  %v114_v42 = vmul.f32 %v2271_v61, %v69_v57 }
  0x92   :  { %v224_v58 = vrot.slane %v167_v34, 6  ;;  %v225_v46 = vrot.slane %v168_v36, 4  ;;  %v115_v55 = vmul.f32 %v2273_v0, %v69_v57 }
  0x93   :  { %v226_v30 = vrot.slane %v169_v38, 2  ;;  %v154_v10 = vadd.f32 %v2275_v2, %v112_v41  ;;  %v155_v48 = vadd.f32 %v2277_v3, %v113_v32  ;;  %v156_v11 = vadd.f32 %v2279_v7, %v114_v42 }
  0x94   :  { %v251_v12 = vsel %vm230_vm0, %v166_v52, %v224_v58  ;;  %v157_v15 = vadd.f32 %v2281_v8, %v115_v55 }
  0x95   :  { %v252_v20 = vsel %vm232_vm1, %v225_v46, %v226_v30  ;;  %v215_v1 = vrot.slane %v155_v48, 6  ;;  %v216_v25 = vrot.slane %v156_v11, 4  ;;  %v485_v49 = vld.sshfl [vmem:[#allocation1] sm:$0xff pattern:$0x73625140] }
  0x96   :  { %v2361_v57 = vsel %vm234_vm2, %v251_v12, %v252_v20  ;;  %v217_v26 = vrot.slane %v157_v15, 2  ;;  %v486_v28 = vld.sshfl [vmem:[#allocation1 + $0x8] sm:$0xff pattern:$0x73625140] }
  0x97   :  { %v242_v34 = vsel %vm230_vm0, %v154_v10, %v215_v1  ;;  %v487_v36 = vld.sshfl [vmem:[#allocation1 + $0x10] sm:$0xff pattern:$0x73625140]  ;;  %v488_v41 = vld.sshfl [vmem:[#allocation1 + $0x18] sm:$0xff pattern:$0x73625140] }
  0x98   :  { %v243_v38 = vsel %vm232_vm1, %v216_v25, %v217_v26  ;;  %612 = vst [vmem:[#allocation1] ss:$4 sm:$0xff] %v238_v45 }
  0x99   :  { %v244_v52 = vsel %vm234_vm2, %v242_v34, %v243_v38 }
  0x9f   :  { %v2366_v32 = vld.sshfl [vmem:[#allocation1] sm:$0xff pattern:$0x73625140]  ;;  %v2368_v42 = vld.sshfl [vmem:[#allocation1 + $0x8] sm:$0xff pattern:$0x73625140] }
  0xa0   :  { %v2370_v58 = vld.sshfl [vmem:[#allocation1 + $0x10] sm:$0xff pattern:$0x73625140]  ;;  %v2372_v46 = vld.sshfl [vmem:[#allocation1 + $0x18] sm:$0xff pattern:$0x73625140] }
  0xa1   :  { %740 = vst [vmem:[#allocation1] ss:$4 sm:$0xff] %v241_v29 }
  0xa8   :  { %v502_v55 = vpop.f32.mrf.mxu0  ;;  %v2374_v10 = vld.sshfl [vmem:[#allocation1] sm:$0xff pattern:$0x73625140]  ;;  %v2376_v11 = vld.sshfl [vmem:[#allocation1 + $0x8] sm:$0xff pattern:$0x73625140] }
  0xa9   :  { %v503_v30 = vadd.f32 %v502_v55, %v485_v49  ;;  %v515_v48 = vpop.f32.mrf.mxu1  ;;  %2713 = vst [vmem:[#allocation12_spill] sm:$0xff] %v2374_v10  ;;  %v2378_v15 = vld.sshfl [vmem:[#allocation1 + $0x10] sm:$0xff pattern:$0x73625140] }
  0xaa   :  { %2714 = vst [vmem:[#allocation13_spill] sm:$0xff] %v2376_v11  ;;  %v516_v12 = vadd.f32 %v515_v48, %v486_v28  ;;  %v2380_v45 = vld.sshfl [vmem:[#allocation1 + $0x18] sm:$0xff pattern:$0x73625140] }
  0xab   :  { %2715 = vst [vmem:[#allocation14_spill] sm:$0xff] %v2378_v15  ;;  %v1786_v20 = vmul.f32 -1.442695, %v503_v30 }
  0xac   :  { %2716 = vst [vmem:[#allocation15_spill] sm:$0xff] %v2380_v45  ;;  %v1787_v1 = vmul.f32 -1.442695, %v516_v12 }
  0xad   :  { %868 = vst [vmem:[#allocation1] ss:$4 sm:$0xff] %v244_v52  ;;  %1856 = vpow2.f32 %v1786_v20 }
  0xae   :  { %1858 = vpow2.f32 %v1787_v1 }
  0xb0   :  { %v528_v25 = vpop.f32.mrf.mxu2  ;;  %v504_v34 = vpop.f32.mrf.mxu0 }
  0xb1   :  { %v541_v26 = vpop.f32.mrf.mxu3  ;;  %v529_v29 = vadd.f32 %v528_v25, %v487_v36  ;;  %v517_v49 = vpop.f32.mrf.mxu1 }
  0xb2   :  { %v542_v34 = vadd.f32 %v541_v26, %v488_v41 }
  0xb3   :  { %v1857_v11 = vpop.eup %1856  ;;  %v1788_v28 = vmul.f32 -1.442695, %v529_v29 }
  0xb4   :  { %v2382_v38 = vld.sshfl [vmem:[#allocation1] sm:$0xff pattern:$0x73625140]  ;;  %v2384_v55 = vld.sshfl [vmem:[#allocation1 + $0x8] sm:$0xff pattern:$0x73625140]  ;;  %v1859_v15 = vpop.eup %1858 }
  0xb5   :  { %2717 = vst [vmem:[#allocation16_spill] sm:$0xff] %v2382_v38  ;;  %v2386_v48 = vld.sshfl [vmem:[#allocation1 + $0x10] sm:$0xff pattern:$0x73625140]  ;;  %v554_v45 = vadd.f32 1.0, %v1857_v11  ;;  %v555_v52 = vadd.f32 1.0, %v1859_v15  ;;  %1860 = vpow2.f32 %v1788_v28 }
  0xb6   :  { %2718 = vst [vmem:[#allocation17_spill] sm:$0xff] %v2384_v55  ;;  %v2388_v30 = vld.sshfl [vmem:[#allocation1 + $0x18] sm:$0xff pattern:$0x73625140] }
  0xb7   :  { %2719 = vst [vmem:[#allocation18_spill] sm:$0xff] %v2386_v48  ;;  %1862 = vrcp.f32 %v554_v45  ;;  %v583_v41 = vand.u32 2147483648, %v555_v52  ;;  %vm562_vm6 = vweird.f32 %v554_v45  ;;  %vm577_vm7 = vweird.f32 %v555_v52 }
  0xb8   :  { %2720 = vst [vmem:[#allocation19_spill] sm:$0xff] %v2388_v30  ;;  %1864 = vrcp.f32 %v555_v52  ;;  %v530_v36 = vpop.f32.mrf.mxu2  ;;  %v568_v30 = vand.u32 2147483648, %v554_v45 }
  0xb9   :  { %996 = vst [vmem:[#allocation1] ss:$4 sm:$0xff] %v2304_v19  ;;  %v543_v12 = vpop.f32.mrf.mxu3  ;;  %v584_v38 = vor.u32 1.1754944e-38, %v583_v41 }
  0xba   :  { %v566_v12 = vand.u32 2147483647, %v554_v45 }
  0xbb   :  { %v1861_v20 = vpop.eup %1860 }
  0xbc   :  { %v556_v25 = vadd.f32 1.0, %v1861_v20  ;;  %v581_v20 = vand.u32 2147483647, %v555_v52  ;;  %vm567_vm9 = vcmp.eq.f32.partialorder %v566_v12, 8.507059e+37 }
  0xbd   :  { %v1863_v1 = vpop.eup %1862 }
  0xbe   :  { %v1865_v29 = vpop.eup %1864  ;;  %v558_v48 = vmul.f32 %v1863_v1, %v554_v45  ;;  %1866 = vrcp.f32 %v556_v25  ;;  %vm563_vm4 = vweird.f32 %v1863_v1  ;;  %vm582_vm11 = vcmp.eq.f32.partialorder %v581_v20, 8.507059e+37 }
  0xbf   :  { %v573_v15 = vmul.f32 %v1865_v29, %v555_v52  ;;  %1868 = vtanh.f32 %v542_v34  ;;  %vm578_vm5 = vweird.f32 %v1865_v29  ;;  %vm564_vm8 = vmor %vm562_vm6, %vm563_vm4  ;;  %vm592_vm13 = vweird.f32 %v556_v25 }
  0xc0   :  { %v2391_v49 = vld.sshfl [vmem:[#allocation1] sm:$0xff pattern:$0x73625140]  ;;  %v2393_v55 = vld.sshfl [vmem:[#allocation1 + $0x8] sm:$0xff pattern:$0x73625140]  ;;  %vm579_vm10 = vmor %vm577_vm7, %vm578_vm5 }
  0xc1   :  { %2721 = vst [vmem:[#allocation20_spill] sm:$0xff] %v2391_v49  ;;  %v2395_v11 = vld.sshfl [vmem:[#allocation1 + $0x10] sm:$0xff pattern:$0x73625140]  ;;  %v559_v19 = vsub.f32 1.0, %v558_v48  ;;  %v574_v36 = vsub.f32 1.0, %v573_v15 }
  0xc2   :  { %2722 = vst [vmem:[#allocation21_spill] sm:$0xff] %v2393_v55  ;;  %v2397_v28 = vld.sshfl [vmem:[#allocation1 + $0x18] sm:$0xff pattern:$0x73625140] }
  0xc3   :  { %2723 = vst [vmem:[#allocation22_spill] sm:$0xff] %v2395_v11  ;;  %v560_v26 = vmul.f32 %v1863_v1, %v559_v19  ;;  %v575_v49 = vmul.f32 %v1865_v29, %v574_v36 }
  0xc4   :  { %2724 = vst [vmem:[#allocation23_spill] sm:$0xff] %v2397_v28  ;;  %v1867_v11 = vpop.eup %1866  ;;  %v569_v28 = vor.u32 1.1754944e-38, %v568_v30 }
  0xc5   :  { %1124 = vst [vmem:[#allocation1] ss:$4 sm:$0xff] %v2352_v56  ;;  %v561_v55 = vadd.f32 %v1863_v1, %v560_v26  ;;  %v576_v48 = vadd.f32 %v1865_v29, %v575_v49  ;;  %v588_v56 = vmul.f32 %v1867_v11, %v556_v25  ;;  %v1869_v34 = vpop.eup %1868  ;;  %vm593_vm12 = vweird.f32 %v1867_v11 }
  0xc6   :  { %vm594_vm14 = vmor %vm592_vm13, %vm593_vm12 }
  0xc7   :  { %v565_v15 = vsel %vm564_vm8, %v1863_v1, %v561_v55  ;;  %v580_v19 = vsel %vm579_vm10, %v1865_v29, %v576_v48  ;;  %v589_v26 = vsub.f32 1.0, %v588_v56  ;;  %v598_v29 = vand.u32 2147483648, %v556_v25 }
  0xc8   :  { %v570_v10 = vsel %vm567_vm9, %v569_v28, %v565_v15  ;;  %v585_v45 = vsel %vm582_vm11, %v584_v38, %v580_v19  ;;  %v596_v28 = vand.u32 2147483647, %v556_v25  ;;  %v2731_v25 = vld [vmem:[#allocation9_spill] sm:$0xff] }
  0xc9   :  { %v604_v7 = vmul.f32 %v1869_v34, %v570_v10  ;;  %v603_v12 = vmul.f32 0.0, %v585_v45  ;;  %v590_v49 = vmul.f32 %v1867_v11, %v589_v26  ;;  %v599_v10 = vor.u32 1.1754944e-38, %v598_v29 }
  0xca   :  { %vm597_vm15 = vcmp.eq.f32.partialorder %v596_v28, 8.507059e+37 }
  0xcb   :  { %v2409_v55 = vadd.f32 %v604_v7, %v603_v12  ;;  %v591_v1 = vadd.f32 %v1867_v11, %v590_v49  ;;  %v2729_v7 = vld [vmem:[#allocation7_spill] sm:$0xff]  ;;  %v49_v12 = vld [vmem:[%s2693_s0 + $0xe] sm:$0x3] }
  0xcc   :  { %v2400_v8 = vld.sshfl [vmem:[#allocation1] sm:$0xff pattern:$0x73625140]  ;;  %v2402_v36 = vld.sshfl [vmem:[#allocation1 + $0x8] sm:$0xff pattern:$0x73625140]  ;;  %88 = vperm.xlu1 %1852, %v49_v12  }
  0xcd   :  { %2725 = vst [vmem:[#allocation24_spill] sm:$0xff] %v2400_v8  ;;  %v2404_v52 = vld.sshfl [vmem:[#allocation1 + $0x10] sm:$0xff pattern:$0x73625140]  ;;  %1870 = vtanh.f32 %v2409_v55  ;;  %v595_v38 = vsel %vm594_vm14, %v1867_v11, %v591_v1 }
  0xce   :  { %2726 = vst [vmem:[#allocation25_spill] sm:$0xff] %v2402_v36  ;;  %v2406_v30 = vld.sshfl [vmem:[#allocation1 + $0x18] sm:$0xff pattern:$0x73625140]  ;;  %v600_v20 = vsel %vm597_vm15, %v599_v10, %v595_v38 }
  0xcf   :  { %2727 = vst [vmem:[#allocation26_spill] sm:$0xff] %v2404_v52 }
  0xd0   :  { %2728 = vst [vmem:[#allocation27_spill] sm:$0xff] %v2406_v30 }
  0xd1   :  { %1252 = vst [vmem:[#allocation1] ss:$4 sm:$0xff] %v2361_v57  ;;  %v2730_v57 = vld [vmem:[#allocation8_spill] sm:$0xff] }
  0xd3   :  { %v1871_v41 = vpop.eup %1870 }
  0xd4   :  { %v607_v48 = vmul.f32 %v1871_v41, %v600_v20 }
  0xd6   :  { %v608_v56 = vpack.c.bf16 %v607_v48, %v607_v48 }
  0xd8   :  { %629 = vmatmul.bf16.vlgmr.msrb.gmra.mxu0 %v608_v56  ;;  %642 = vmatmul.bf16.vlgmr.msrb.gmra.mxu1 %v608_v56 }
  0xd9   :  { %655 = vmatmul.bf16.vlgmr.msrb.gmra.mxu2 %v608_v56  ;;  %668 = vmatmul.bf16.vlgmr.msrb.gmra.mxu3 %v608_v56 }
  0xda   :  { %877 = vmatpush.bf16.msrb.mxu0 %v2079_v5  ;;  %890 = vmatpush.bf16.msrb.mxu1 %v2081_v9 }
  0xdb   :  { %903 = vmatpush.bf16.msrb.mxu2 %v2084_v13  ;;  %916 = vmatpush.bf16.msrb.mxu3 %v2086_v14 }
  0xde   :  { %878 = vmatpush.bf16.msrb.mxu0 %v2089_v18  ;;  %891 = vmatpush.bf16.msrb.mxu1 %v2093_v22 }
  0xdf   :  { %904 = vmatpush.bf16.msrb.mxu2 %v2095_v23  ;;  %917 = vmatpush.bf16.msrb.mxu3 %v2100_v27 }
  0xe2   :  { %879 = vmatpush.bf16.msrb.mxu0 %v2103_v31  ;;  %892 = vmatpush.bf16.msrb.mxu1 %v2106_v35 }
  0xe3   :  { %905 = vmatpush.bf16.msrb.mxu2 %v2110_v39  ;;  %918 = vmatpush.bf16.msrb.mxu3 %v2112_v40 }
  0xe6   :  { %880 = vmatpush.bf16.msrb.mxu0 %v2115_v47  ;;  %893 = vmatpush.bf16.msrb.mxu1 %v2121_v50 }
  0xe7   :  { %906 = vmatpush.bf16.msrb.mxu2 %v2125_v53  ;;  %919 = vmatpush.bf16.msrb.mxu3 %v2127_v54 }
  0xea   :  { %881 = vmatpush.bf16.msrb.mxu0 %v2133_v62  ;;  %894 = vmatpush.bf16.msrb.mxu1 %v2136_v63 }
  0xeb   :  { %907 = vmatpush.bf16.msrb.mxu2 %v2140_v4  ;;  %920 = vmatpush.bf16.msrb.mxu3 %v2142_v6 }
  0xee   :  { %882 = vmatpush.bf16.msrb.mxu0 %v2148_v16  ;;  %895 = vmatpush.bf16.msrb.mxu1 %v2151_v17 }
  0xef   :  { %908 = vmatpush.bf16.msrb.mxu2 %v2155_v21  ;;  %921 = vmatpush.bf16.msrb.mxu3 %v2157_v24 }
  0xf2   :  { %883 = vmatpush.bf16.msrb.mxu0 %v2160_v33  ;;  %896 = vmatpush.bf16.msrb.mxu1 %v2166_v37 }
  0xf3   :  { %909 = vmatpush.bf16.msrb.mxu2 %v2170_v43  ;;  %922 = vmatpush.bf16.msrb.mxu3 %v2172_v44 }
  0xf6   :  { %884 = vmatpush.bf16.msrb.mxu0 %v2175_v51  ;;  %897 = vmatpush.bf16.msrb.mxu1 %v2729_v7 }
  0xf7   :  { %910 = vmatpush.bf16.msrb.mxu2 %v2730_v57  ;;  %923 = vmatpush.bf16.msrb.mxu3 %v2731_v25 }
 0x155   :  { %v630_v11 = vpop.f32.mrf.mxu0  ;;  %v643_v15 = vpop.f32.mrf.mxu1 }
 0x156   :  { %v631_v34 = vadd.f32 %v630_v11, %v2366_v32  ;;  %v644_v19 = vadd.f32 %v643_v15, %v2368_v42 }
 0x158   :  { %v1789_v26 = vmul.f32 -1.442695, %v631_v34  ;;  %v1790_v45 = vmul.f32 -1.442695, %v644_v19 }
 0x15a   :  { %1872 = vpow2.f32 %v1789_v26 }
 0x15b   :  { %1874 = vpow2.f32 %v1790_v45 }
 0x15c   :  { %v656_v49 = vpop.f32.mrf.mxu2  ;;  %v669_v1 = vpop.f32.mrf.mxu3 }
 0x15d   :  { %v657_v29 = vadd.f32 %v656_v49, %v2370_v58  ;;  %v632_v28 = vpop.f32.mrf.mxu0  ;;  %v645_v38 = vpop.f32.mrf.mxu1  ;;  %v670_v19 = vadd.f32 %v669_v1, %v2372_v46 }
 0x15f   :  { %v1791_v10 = vmul.f32 -1.442695, %v657_v29 }
 0x160   :  { %v1873_v41 = vpop.eup %1872 }
 0x161   :  { %v1875_v32 = vpop.eup %1874  ;;  %v682_v20 = vadd.f32 1.0, %v1873_v41  ;;  %1876 = vpow2.f32 %v1791_v10 }
 0x162   :  { %v683_v42 = vadd.f32 1.0, %v1875_v32 }
 0x163   :  { %1878 = vrcp.f32 %v682_v20  ;;  %v696_v29 = vand.u32 2147483648, %v682_v20  ;;  %v694_v10 = vand.u32 2147483647, %v682_v20  ;;  %vm690_vm5 = vweird.f32 %v682_v20 }
 0x164   :  { %1880 = vrcp.f32 %v683_v42  ;;  %v658_v48 = vpop.f32.mrf.mxu2  ;;  %v671_v56 = vpop.f32.mrf.mxu3  ;;  %v711_v28 = vand.u32 2147483648, %v683_v42  ;;  %v709_v32 = vand.u32 2147483647, %v683_v42  ;;  %vm705_vm6 = vweird.f32 %v683_v42 }
 0x165   :  { %v697_v1 = vor.u32 1.1754944e-38, %v696_v29  ;;  %vm695_vm9 = vcmp.eq.f32.partialorder %v694_v10, 8.507059e+37 }
 0x166   :  { %vm710_vm10 = vcmp.eq.f32.partialorder %v709_v32, 8.507059e+37 }
 0x167   :  { %v1877_v11 = vpop.eup %1876 }
 0x168   :  { %v684_v15 = vadd.f32 1.0, %v1877_v11 }
 0x169   :  { %v1879_v34 = vpop.eup %1878 }
 0x16a   :  { %v1881_v26 = vpop.eup %1880  ;;  %v686_v45 = vmul.f32 %v1879_v34, %v682_v20  ;;  %1882 = vrcp.f32 %v684_v15  ;;  %vm691_vm3 = vweird.f32 %v1879_v34  ;;  %v726_v29 = vand.u32 2147483648, %v684_v15 }
 0x16b   :  { %v701_v58 = vmul.f32 %v1881_v26, %v683_v42  ;;  %1884 = vtanh.f32 %v670_v19  ;;  %vm706_vm4 = vweird.f32 %v1881_v26  ;;  %vm692_vm7 = vmor %vm690_vm5, %vm691_vm3  ;;  %vm720_vm12 = vweird.f32 %v684_v15 }
 0x16c   :  { %v687_v12 = vsub.f32 1.0, %v686_v45  ;;  %vm707_vm8 = vmor %vm705_vm6, %vm706_vm4  ;;  %v712_v45 = vor.u32 1.1754944e-38, %v711_v28  ;;  %v727_v10 = vor.u32 1.1754944e-38, %v726_v29  ;;  %v2734_v29 = vld [vmem:[#allocation12_spill] sm:$0xff] }
 0x16d   :  { %v702_v49 = vsub.f32 1.0, %v701_v58 }
 0x16e   :  { %v688_v38 = vmul.f32 %v1879_v34, %v687_v12 }
 0x16f   :  { %v703_v41 = vmul.f32 %v1881_v26, %v702_v49 }
 0x170   :  { %v1883_v48 = vpop.eup %1882  ;;  %v689_v56 = vadd.f32 %v1879_v34, %v688_v38 }
 0x171   :  { %v716_v46 = vmul.f32 %v1883_v48, %v684_v15  ;;  %v704_v11 = vadd.f32 %v1881_v26, %v703_v41  ;;  %v1885_v19 = vpop.eup %1884  ;;  %vm721_vm11 = vweird.f32 %v1883_v48 }
 0x172   :  { %v693_v58 = vsel %vm692_vm7, %v1879_v34, %v689_v56  ;;  %v724_v34 = vand.u32 2147483647, %v684_v15  ;;  %vm722_vm13 = vmor %vm720_vm12, %vm721_vm11 }
 0x173   :  { %v717_v30 = vsub.f32 1.0, %v716_v46  ;;  %v698_v12 = vsel %vm695_vm9, %v697_v1, %v693_v58  ;;  %v708_v52 = vsel %vm707_vm8, %v1881_v26, %v704_v11  ;;  %v2732_v46 = vld [vmem:[#allocation10_spill] sm:$0xff]  ;;  %v2733_v11 = vld [vmem:[#allocation11_spill] sm:$0xff] }
 0x174   :  { %v713_v49 = vsel %vm710_vm10, %v712_v45, %v708_v52  ;;  %v732_v36 = vmul.f32 %v1885_v19, %v698_v12  ;;  %vm725_vm14 = vcmp.eq.f32.partialorder %v724_v34, 8.507059e+37 }
 0x175   :  { %v731_v8 = vmul.f32 %v713_v49, %v2409_v55  ;;  %v718_v38 = vmul.f32 %v1883_v48, %v717_v30 }
 0x177   :  { %v2452_v20 = vadd.f32 %v732_v36, %v731_v8  ;;  %v719_v42 = vadd.f32 %v1883_v48, %v718_v38  ;;  %v89_v8 = vpop.permute.xlu1 %88 }
 0x178   :  { %v128_v36 = vmul.f32 %v2267_v59, %v89_v8  ;;  %v129_v30 = vmul.f32 %v2269_v60, %v89_v8  ;;  %v130_v55 = vmul.f32 %v2271_v61, %v89_v8  ;;  %v131_v15 = vmul.f32 %v2273_v0, %v89_v8  ;;  %v2497_v60 = vld.sshfl [vmem:[#allocation1] sm:$0xff pattern:$0x73625140]  ;;  %v2500_v0 = vld.sshfl [vmem:[#allocation1 + $0x8] sm:$0xff pattern:$0x73625140] }
 0x179   :  { %1886 = vtanh.f32 %v2452_v20  ;;  %v723_v28 = vsel %vm722_vm13, %v1883_v48, %v719_v42  ;;  %v2736_v8 = vld [vmem:[#allocation14_spill] sm:$0xff] }
 0x17a   :  { %v728_v41 = vsel %vm725_vm14, %v727_v10, %v723_v28  ;;  %v170_v48 = vadd.f32 %v2275_v2, %v128_v36  ;;  %v171_v56 = vadd.f32 %v2277_v3, %v129_v30  ;;  %v172_v1 = vadd.f32 %v2732_v46, %v130_v55  ;;  %v2502_v2 = vld.sshfl [vmem:[#allocation1 + $0x10] sm:$0xff pattern:$0x73625140]  ;;  %v2504_v3 = vld.sshfl [vmem:[#allocation1 + $0x18] sm:$0xff pattern:$0x73625140] }
 0x17b   :  { %v173_v45 = vadd.f32 %v2733_v11, %v131_v15  ;;  %v2735_v28 = vld [vmem:[#allocation13_spill] sm:$0xff] }
 0x17c   :  { %v227_v58 = vrot.slane %v171_v56, 6  ;;  %v228_v19 = vrot.slane %v172_v1, 4 }
 0x17d   :  { %v229_v12 = vrot.slane %v173_v45, 2 }
 0x17e   :  { %v254_v49 = vsel %vm230_vm0, %v170_v48, %v227_v58 }
 0x17f   :  { %v1887_v26 = vpop.eup %1886  ;;  %v255_v59 = vsel %vm232_vm1, %v228_v19, %v229_v12 }
 0x180   :  { %v735_v52 = vmul.f32 %v1887_v26, %v728_v41  ;;  %v256_v61 = vsel %vm234_vm2, %v254_v49, %v255_v59  ;;  %v2737_v49 = vld [vmem:[#allocation15_spill] sm:$0xff] }
 0x181   :  { %1380 = vst [vmem:[#allocation1] ss:$4 sm:$0xff] %v256_v61 }
 0x182   :  { %v736_v32 = vpack.c.bf16 %v735_v52, %v735_v52 }
 0x184   :  { %757 = vmatmul.bf16.vlgmr.msra.gmra.mxu0 %v736_v32  ;;  %770 = vmatmul.bf16.vlgmr.msra.gmra.mxu1 %v736_v32 }
 0x185   :  { %783 = vmatmul.bf16.vlgmr.msra.gmra.mxu2 %v736_v32  ;;  %796 = vmatmul.bf16.vlgmr.msra.gmra.mxu3 %v736_v32 }
 0x186   :  { %1005 = vmatpush.bf16.msra.mxu0 %v2079_v5  ;;  %1018 = vmatpush.bf16.msra.mxu1 %v2081_v9 }
 0x187   :  { %1031 = vmatpush.bf16.msra.mxu2 %v2084_v13  ;;  %1044 = vmatpush.bf16.msra.mxu3 %v2086_v14 }
 0x18a   :  { %1006 = vmatpush.bf16.msra.mxu0 %v2089_v18  ;;  %1019 = vmatpush.bf16.msra.mxu1 %v2093_v22 }
 0x18b   :  { %1032 = vmatpush.bf16.msra.mxu2 %v2095_v23  ;;  %1045 = vmatpush.bf16.msra.mxu3 %v2100_v27 }
 0x18e   :  { %1007 = vmatpush.bf16.msra.mxu0 %v2103_v31  ;;  %1020 = vmatpush.bf16.msra.mxu1 %v2106_v35 }
 0x18f   :  { %1033 = vmatpush.bf16.msra.mxu2 %v2110_v39  ;;  %1046 = vmatpush.bf16.msra.mxu3 %v2112_v40 }
 0x192   :  { %1008 = vmatpush.bf16.msra.mxu0 %v2115_v47  ;;  %1021 = vmatpush.bf16.msra.mxu1 %v2121_v50 }
 0x193   :  { %1034 = vmatpush.bf16.msra.mxu2 %v2125_v53  ;;  %1047 = vmatpush.bf16.msra.mxu3 %v2127_v54 }
 0x196   :  { %1009 = vmatpush.bf16.msra.mxu0 %v2133_v62  ;;  %1022 = vmatpush.bf16.msra.mxu1 %v2136_v63 }
 0x197   :  { %1035 = vmatpush.bf16.msra.mxu2 %v2140_v4  ;;  %1048 = vmatpush.bf16.msra.mxu3 %v2142_v6 }
 0x19a   :  { %1010 = vmatpush.bf16.msra.mxu0 %v2148_v16  ;;  %1023 = vmatpush.bf16.msra.mxu1 %v2151_v17 }
 0x19b   :  { %1036 = vmatpush.bf16.msra.mxu2 %v2155_v21  ;;  %1049 = vmatpush.bf16.msra.mxu3 %v2157_v24 }
 0x19e   :  { %1011 = vmatpush.bf16.msra.mxu0 %v2160_v33  ;;  %1024 = vmatpush.bf16.msra.mxu1 %v2166_v37 }
 0x19f   :  { %1037 = vmatpush.bf16.msra.mxu2 %v2170_v43  ;;  %1050 = vmatpush.bf16.msra.mxu3 %v2172_v44 }
 0x1a2   :  { %1012 = vmatpush.bf16.msra.mxu0 %v2175_v51  ;;  %1025 = vmatpush.bf16.msra.mxu1 %v2729_v7 }
 0x1a3   :  { %1038 = vmatpush.bf16.msra.mxu2 %v2730_v57  ;;  %1051 = vmatpush.bf16.msra.mxu3 %v2731_v25 }
 0x201   :  { %v758_v38 = vpop.f32.mrf.mxu0  ;;  %v771_v42 = vpop.f32.mrf.mxu1 }
 0x202   :  { %v759_v34 = vadd.f32 %v758_v38, %v2734_v29  ;;  %v772_v10 = vadd.f32 %v771_v42, %v2735_v28 }
 0x204   :  { %v1792_v26 = vmul.f32 -1.442695, %v759_v34  ;;  %v1793_v41 = vmul.f32 -1.442695, %v772_v10 }
 0x206   :  { %1888 = vpow2.f32 %v1792_v26 }
 0x207   :  { %1890 = vpow2.f32 %v1793_v41 }
 0x208   :  { %v784_v52 = vpop.f32.mrf.mxu2  ;;  %v797_v32 = vpop.f32.mrf.mxu3 }
 0x209   :  { %v785_v36 = vadd.f32 %v784_v52, %v2736_v8  ;;  %v760_v30 = vpop.f32.mrf.mxu0  ;;  %v773_v55 = vpop.f32.mrf.mxu1  ;;  %v798_v59 = vadd.f32 %v797_v32, %v2737_v49 }
 0x20b   :  { %v1794_v15 = vmul.f32 -1.442695, %v785_v36 }
 0x20c   :  { %v1889_v48 = vpop.eup %1888 }
 0x20d   :  { %v1891_v56 = vpop.eup %1890  ;;  %v810_v46 = vadd.f32 1.0, %v1889_v48  ;;  %1892 = vpow2.f32 %v1794_v15 }
 0x20e   :  { %v811_v1 = vadd.f32 1.0, %v1891_v56 }
 0x20f   :  { %1894 = vrcp.f32 %v810_v46  ;;  %v824_v28 = vand.u32 2147483648, %v810_v46  ;;  %v822_v41 = vand.u32 2147483647, %v810_v46  ;;  %vm818_vm4 = vweird.f32 %v810_v46 }
 0x210   :  { %1896 = vrcp.f32 %v811_v1  ;;  %v786_v11 = vpop.f32.mrf.mxu2  ;;  %v799_v45 = vpop.f32.mrf.mxu3  ;;  %v839_v10 = vand.u32 2147483648, %v811_v1  ;;  %v837_v8 = vand.u32 2147483647, %v811_v1  ;;  %vm833_vm5 = vweird.f32 %v811_v1 }
 0x211   :  { %v825_v55 = vor.u32 1.1754944e-38, %v824_v28  ;;  %vm823_vm8 = vcmp.eq.f32.partialorder %v822_v41, 8.507059e+37 }
 0x212   :  { %v840_v48 = vor.u32 1.1754944e-38, %v839_v10  ;;  %vm838_vm9 = vcmp.eq.f32.partialorder %v837_v8, 8.507059e+37  ;;  %v2738_v8 = vld [vmem:[#allocation16_spill] sm:$0xff] }
 0x213   :  { %v1893_v58 = vpop.eup %1892 }
 0x214   :  { %v812_v19 = vadd.f32 1.0, %v1893_v58 }
 0x215   :  { %v1895_v12 = vpop.eup %1894 }
 0x216   :  { %v1897_v61 = vpop.eup %1896  ;;  %v814_v38 = vmul.f32 %v1895_v12, %v810_v46  ;;  %1898 = vrcp.f32 %v812_v19  ;;  %vm819_vm15 = vweird.f32 %v1895_v12  ;;  %vm848_vm11 = vweird.f32 %v812_v19 }
 0x217   :  { %v829_v42 = vmul.f32 %v1897_v61, %v811_v1  ;;  %1900 = vtanh.f32 %v798_v59  ;;  %vm834_vm3 = vweird.f32 %v1897_v61  ;;  %vm820_vm6 = vmor %vm818_vm4, %vm819_vm15 }
 0x218   :  { %v815_v29 = vsub.f32 1.0, %v814_v38  ;;  %vm835_vm7 = vmor %vm833_vm5, %vm834_vm3 }
 0x219   :  { %v830_v34 = vsub.f32 1.0, %v829_v42 }
 0x21a   :  { %v816_v26 = vmul.f32 %v1895_v12, %v815_v29 }
 0x21b   :  { %v831_v52 = vmul.f32 %v1897_v61, %v830_v34  ;;  %v854_v34 = vand.u32 2147483648, %v812_v19 }
 0x21c   :  { %v1899_v36 = vpop.eup %1898  ;;  %v817_v30 = vadd.f32 %v1895_v12, %v816_v26 }
 0x21d   :  { %v844_v32 = vmul.f32 %v1899_v36, %v812_v19  ;;  %v832_v15 = vadd.f32 %v1897_v61, %v831_v52  ;;  %v1901_v11 = vpop.eup %1900  ;;  %vm849_vm10 = vweird.f32 %v1899_v36  ;;  %v855_v10 = vor.u32 1.1754944e-38, %v854_v34 }
 0x21e   :  { %v821_v56 = vsel %vm820_vm6, %v1895_v12, %v817_v30  ;;  %v852_v12 = vand.u32 2147483647, %v812_v19  ;;  %vm850_vm12 = vmor %vm848_vm11, %vm849_vm10  ;;  %v2739_v30 = vld [vmem:[#allocation17_spill] sm:$0xff] }
 0x21f   :  { %v845_v45 = vsub.f32 1.0, %v844_v32  ;;  %v826_v58 = vsel %vm823_vm8, %v825_v55, %v821_v56  ;;  %v836_v49 = vsel %vm835_vm7, %v1897_v61, %v832_v15 }
 0x220   :  { %v841_v59 = vsel %vm838_vm9, %v840_v48, %v836_v49  ;;  %v860_v38 = vmul.f32 %v1901_v11, %v826_v58  ;;  %vm853_vm13 = vcmp.eq.f32.partialorder %v852_v12, 8.507059e+37  ;;  %v2740_v11 = vld [vmem:[#allocation18_spill] sm:$0xff] }
 0x221   :  { %v859_v42 = vmul.f32 %v841_v59, %v2452_v20  ;;  %v846_v29 = vmul.f32 %v1899_v36, %v845_v45 }
 0x223   :  { %v2511_v46 = vadd.f32 %v860_v38, %v859_v42  ;;  %v847_v1 = vadd.f32 %v1899_v36, %v846_v29 }
 0x225   :  { %1902 = vtanh.f32 %v2511_v46  ;;  %v851_v28 = vsel %vm850_vm12, %v1899_v36, %v847_v1 }
 0x226   :  { %v856_v26 = vsel %vm853_vm13, %v855_v10, %v851_v28 }
 0x22b   :  { %v1903_v61 = vpop.eup %1902 }
 0x22c   :  { %v863_v41 = vmul.f32 %v1903_v61, %v856_v26  ;;  %v2741_v26 = vld [vmem:[#allocation19_spill] sm:$0xff] }
 0x22e   :  { %v864_v52 = vpack.c.bf16 %v863_v41, %v863_v41 }
 0x230   :  { %885 = vmatmul.bf16.vlgmr.msrb.gmra.mxu0 %v864_v52  ;;  %898 = vmatmul.bf16.vlgmr.msrb.gmra.mxu1 %v864_v52 }
 0x231   :  { %911 = vmatmul.bf16.vlgmr.msrb.gmra.mxu2 %v864_v52  ;;  %924 = vmatmul.bf16.vlgmr.msrb.gmra.mxu3 %v864_v52 }
 0x232   :  { %1133 = vmatpush.bf16.msrb.mxu0 %v2079_v5  ;;  %1146 = vmatpush.bf16.msrb.mxu1 %v2081_v9 }
 0x233   :  { %1159 = vmatpush.bf16.msrb.mxu2 %v2084_v13  ;;  %1172 = vmatpush.bf16.msrb.mxu3 %v2086_v14 }
 0x236   :  { %1134 = vmatpush.bf16.msrb.mxu0 %v2089_v18  ;;  %1147 = vmatpush.bf16.msrb.mxu1 %v2093_v22 }
 0x237   :  { %1160 = vmatpush.bf16.msrb.mxu2 %v2095_v23  ;;  %1173 = vmatpush.bf16.msrb.mxu3 %v2100_v27 }
 0x23a   :  { %1135 = vmatpush.bf16.msrb.mxu0 %v2103_v31  ;;  %1148 = vmatpush.bf16.msrb.mxu1 %v2106_v35 }
 0x23b   :  { %1161 = vmatpush.bf16.msrb.mxu2 %v2110_v39  ;;  %1174 = vmatpush.bf16.msrb.mxu3 %v2112_v40 }
 0x23e   :  { %1136 = vmatpush.bf16.msrb.mxu0 %v2115_v47  ;;  %1149 = vmatpush.bf16.msrb.mxu1 %v2121_v50 }
 0x23f   :  { %1162 = vmatpush.bf16.msrb.mxu2 %v2125_v53  ;;  %1175 = vmatpush.bf16.msrb.mxu3 %v2127_v54 }
 0x242   :  { %1137 = vmatpush.bf16.msrb.mxu0 %v2133_v62  ;;  %1150 = vmatpush.bf16.msrb.mxu1 %v2136_v63 }
 0x243   :  { %1163 = vmatpush.bf16.msrb.mxu2 %v2140_v4  ;;  %1176 = vmatpush.bf16.msrb.mxu3 %v2142_v6 }
 0x246   :  { %1138 = vmatpush.bf16.msrb.mxu0 %v2148_v16  ;;  %1151 = vmatpush.bf16.msrb.mxu1 %v2151_v17 }
 0x247   :  { %1164 = vmatpush.bf16.msrb.mxu2 %v2155_v21  ;;  %1177 = vmatpush.bf16.msrb.mxu3 %v2157_v24 }
 0x24a   :  { %1139 = vmatpush.bf16.msrb.mxu0 %v2160_v33  ;;  %1152 = vmatpush.bf16.msrb.mxu1 %v2166_v37 }
 0x24b   :  { %1165 = vmatpush.bf16.msrb.mxu2 %v2170_v43  ;;  %1178 = vmatpush.bf16.msrb.mxu3 %v2172_v44 }
 0x24e   :  { %1140 = vmatpush.bf16.msrb.mxu0 %v2175_v51  ;;  %1153 = vmatpush.bf16.msrb.mxu1 %v2729_v7 }
 0x24f   :  { %1166 = vmatpush.bf16.msrb.mxu2 %v2730_v57  ;;  %1179 = vmatpush.bf16.msrb.mxu3 %v2731_v25 }
 0x2ad   :  { %v886_v20 = vpop.f32.mrf.mxu0  ;;  %v899_v19 = vpop.f32.mrf.mxu1 }
 0x2ae   :  { %v887_v36 = vadd.f32 %v886_v20, %v2738_v8  ;;  %v900_v32 = vadd.f32 %v899_v19, %v2739_v30 }
 0x2b0   :  { %v1795_v55 = vmul.f32 -1.442695, %v887_v36  ;;  %v1796_v15 = vmul.f32 -1.442695, %v900_v32 }
 0x2b2   :  { %1904 = vpow2.f32 %v1795_v55 }
 0x2b3   :  { %1906 = vpow2.f32 %v1796_v15 }
 0x2b4   :  { %v912_v48 = vpop.f32.mrf.mxu2  ;;  %v925_v56 = vpop.f32.mrf.mxu3 }
 0x2b5   :  { %v913_v45 = vadd.f32 %v912_v48, %v2740_v11  ;;  %v888_v58 = vpop.f32.mrf.mxu0  ;;  %v901_v49 = vpop.f32.mrf.mxu1  ;;  %v926_v41 = vadd.f32 %v925_v56, %v2741_v26 }
 0x2b7   :  { %v1797_v59 = vmul.f32 -1.442695, %v913_v45 }
 0x2b8   :  { %v1905_v38 = vpop.eup %1904 }
 0x2b9   :  { %v1907_v42 = vpop.eup %1906  ;;  %v938_v29 = vadd.f32 1.0, %v1905_v38  ;;  %1908 = vpow2.f32 %v1797_v59 }
 0x2ba   :  { %v939_v1 = vadd.f32 1.0, %v1907_v42 }
 0x2bb   :  { %1910 = vrcp.f32 %v938_v29  ;;  %v952_v30 = vand.u32 2147483648, %v938_v29  ;;  %v950_v15 = vand.u32 2147483647, %v938_v29  ;;  %vm946_vm3 = vweird.f32 %v938_v29 }
 0x2bc   :  { %1912 = vrcp.f32 %v939_v1  ;;  %v914_v34 = vpop.f32.mrf.mxu2  ;;  %v927_v12 = vpop.f32.mrf.mxu3  ;;  %v967_v32 = vand.u32 2147483648, %v939_v1  ;;  %v965_v11 = vand.u32 2147483647, %v939_v1  ;;  %vm961_vm4 = vweird.f32 %v939_v1 }
 0x2bd   :  { %v953_v49 = vor.u32 1.1754944e-38, %v952_v30  ;;  %vm951_vm7 = vcmp.eq.f32.partialorder %v950_v15, 8.507059e+37 }
 0x2be   :  { %v968_v38 = vor.u32 1.1754944e-38, %v967_v32  ;;  %vm966_vm8 = vcmp.eq.f32.partialorder %v965_v11, 8.507059e+37  ;;  %v2742_v11 = vld [vmem:[#allocation20_spill] sm:$0xff] }
 0x2bf   :  { %v1909_v28 = vpop.eup %1908 }
 0x2c0   :  { %v940_v10 = vadd.f32 1.0, %v1909_v28 }
 0x2c1   :  { %v1911_v61 = vpop.eup %1910 }
 0x2c2   :  { %v1913_v52 = vpop.eup %1912  ;;  %v942_v20 = vmul.f32 %v1911_v61, %v938_v29  ;;  %1914 = vrcp.f32 %v940_v10  ;;  %vm947_vm14 = vweird.f32 %v1911_v61  ;;  %vm976_vm10 = vweird.f32 %v940_v10 }
 0x2c3   :  { %v957_v19 = vmul.f32 %v1913_v52, %v939_v1  ;;  %1916 = vtanh.f32 %v926_v41  ;;  %vm962_vm15 = vweird.f32 %v1913_v52  ;;  %vm948_vm5 = vmor %vm946_vm3, %vm947_vm14 }
 0x2c4   :  { %v943_v8 = vsub.f32 1.0, %v942_v20  ;;  %vm963_vm6 = vmor %vm961_vm4, %vm962_vm15 }
 0x2c5   :  { %v958_v36 = vsub.f32 1.0, %v957_v19 }
 0x2c6   :  { %v944_v55 = vmul.f32 %v1911_v61, %v943_v8 }
 0x2c7   :  { %v959_v48 = vmul.f32 %v1913_v52, %v958_v36  ;;  %v982_v36 = vand.u32 2147483648, %v940_v10 }
 0x2c8   :  { %v1915_v45 = vpop.eup %1914  ;;  %v945_v58 = vadd.f32 %v1911_v61, %v944_v55 }
 0x2c9   :  { %v972_v56 = vmul.f32 %v1915_v45, %v940_v10  ;;  %v960_v59 = vadd.f32 %v1913_v52, %v959_v48  ;;  %v1917_v34 = vpop.eup %1916  ;;  %vm977_vm9 = vweird.f32 %v1915_v45  ;;  %v983_v32 = vor.u32 1.1754944e-38, %v982_v36 }
 0x2ca   :  { %v949_v42 = vsel %vm948_vm5, %v1911_v61, %v945_v58  ;;  %v980_v61 = vand.u32 2147483647, %v940_v10  ;;  %vm978_vm11 = vmor %vm976_vm10, %vm977_vm9  ;;  %v2743_v58 = vld [vmem:[#allocation21_spill] sm:$0xff] }
 0x2cb   :  { %v973_v12 = vsub.f32 1.0, %v972_v56  ;;  %v954_v28 = vsel %vm951_vm7, %v953_v49, %v949_v42  ;;  %v964_v26 = vsel %vm963_vm6, %v1913_v52, %v960_v59 }
 0x2cc   :  { %v969_v41 = vsel %vm966_vm8, %v968_v38, %v964_v26  ;;  %v988_v20 = vmul.f32 %v1917_v34, %v954_v28  ;;  %vm981_vm12 = vcmp.eq.f32.partialorder %v980_v61, 8.507059e+37  ;;  %v2744_v34 = vld [vmem:[#allocation22_spill] sm:$0xff] }
 0x2cd   :  { %v987_v19 = vmul.f32 %v969_v41, %v2511_v46  ;;  %v974_v8 = vmul.f32 %v1915_v45, %v973_v12 }
 0x2cf   :  { %v2551_v29 = vadd.f32 %v988_v20, %v987_v19  ;;  %v975_v1 = vadd.f32 %v1915_v45, %v974_v8 }
 0x2d1   :  { %1918 = vtanh.f32 %v2551_v29  ;;  %v979_v30 = vsel %vm978_vm11, %v1915_v45, %v975_v1 }
 0x2d2   :  { %v984_v55 = vsel %vm981_vm12, %v983_v32, %v979_v30 }
 0x2d7   :  { %v1919_v52 = vpop.eup %1918 }
 0x2d8   :  { %v991_v15 = vmul.f32 %v1919_v52, %v984_v55  ;;  %v2745_v55 = vld [vmem:[#allocation23_spill] sm:$0xff] }
 0x2da   :  { %v992_v48 = vpack.c.bf16 %v991_v15, %v991_v15 }
 0x2dc   :  { %1013 = vmatmul.bf16.vlgmr.msra.gmra.mxu0 %v992_v48  ;;  %1026 = vmatmul.bf16.vlgmr.msra.gmra.mxu1 %v992_v48 }
 0x2dd   :  { %1039 = vmatmul.bf16.vlgmr.msra.gmra.mxu2 %v992_v48  ;;  %1052 = vmatmul.bf16.vlgmr.msra.gmra.mxu3 %v992_v48 }
 0x2de   :  { %1261 = vmatpush.bf16.msra.mxu0 %v2079_v5  ;;  %1274 = vmatpush.bf16.msra.mxu1 %v2081_v9 }
 0x2df   :  { %1287 = vmatpush.bf16.msra.mxu2 %v2084_v13  ;;  %1300 = vmatpush.bf16.msra.mxu3 %v2086_v14 }
 0x2e2   :  { %1262 = vmatpush.bf16.msra.mxu0 %v2089_v18  ;;  %1275 = vmatpush.bf16.msra.mxu1 %v2093_v22 }
 0x2e3   :  { %1288 = vmatpush.bf16.msra.mxu2 %v2095_v23  ;;  %1301 = vmatpush.bf16.msra.mxu3 %v2100_v27 }
 0x2e6   :  { %1263 = vmatpush.bf16.msra.mxu0 %v2103_v31  ;;  %1276 = vmatpush.bf16.msra.mxu1 %v2106_v35 }
 0x2e7   :  { %1289 = vmatpush.bf16.msra.mxu2 %v2110_v39  ;;  %1302 = vmatpush.bf16.msra.mxu3 %v2112_v40 }
 0x2ea   :  { %1264 = vmatpush.bf16.msra.mxu0 %v2115_v47  ;;  %1277 = vmatpush.bf16.msra.mxu1 %v2121_v50 }
 0x2eb   :  { %1290 = vmatpush.bf16.msra.mxu2 %v2125_v53  ;;  %1303 = vmatpush.bf16.msra.mxu3 %v2127_v54 }
 0x2ee   :  { %1265 = vmatpush.bf16.msra.mxu0 %v2133_v62  ;;  %1278 = vmatpush.bf16.msra.mxu1 %v2136_v63 }
 0x2ef   :  { %1291 = vmatpush.bf16.msra.mxu2 %v2140_v4  ;;  %1304 = vmatpush.bf16.msra.mxu3 %v2142_v6 }
 0x2f2   :  { %1266 = vmatpush.bf16.msra.mxu0 %v2148_v16  ;;  %1279 = vmatpush.bf16.msra.mxu1 %v2151_v17 }
 0x2f3   :  { %1292 = vmatpush.bf16.msra.mxu2 %v2155_v21  ;;  %1305 = vmatpush.bf16.msra.mxu3 %v2157_v24 }
 0x2f6   :  { %1267 = vmatpush.bf16.msra.mxu0 %v2160_v33  ;;  %1280 = vmatpush.bf16.msra.mxu1 %v2166_v37 }
 0x2f7   :  { %1293 = vmatpush.bf16.msra.mxu2 %v2170_v43  ;;  %1306 = vmatpush.bf16.msra.mxu3 %v2172_v44 }
 0x2fa   :  { %1268 = vmatpush.bf16.msra.mxu0 %v2175_v51  ;;  %1281 = vmatpush.bf16.msra.mxu1 %v2729_v7 }
 0x2fb   :  { %1294 = vmatpush.bf16.msra.mxu2 %v2730_v57  ;;  %1307 = vmatpush.bf16.msra.mxu3 %v2731_v25 }
 0x359   :  { %v1014_v46 = vpop.f32.mrf.mxu0  ;;  %v1027_v10 = vpop.f32.mrf.mxu1 }
 0x35a   :  { %v1015_v45 = vadd.f32 %v1014_v46, %v2742_v11  ;;  %v1028_v56 = vadd.f32 %v1027_v10, %v2743_v58 }
 0x35c   :  { %v1798_v49 = vmul.f32 -1.442695, %v1015_v45  ;;  %v1799_v59 = vmul.f32 -1.442695, %v1028_v56 }
 0x35e   :  { %1920 = vpow2.f32 %v1798_v49 }
 0x35f   :  { %1922 = vpow2.f32 %v1799_v59 }
 0x360   :  { %v1040_v38 = vpop.f32.mrf.mxu2  ;;  %v1053_v42 = vpop.f32.mrf.mxu3 }
 0x361   :  { %v1041_v12 = vadd.f32 %v1040_v38, %v2744_v34  ;;  %v1016_v28 = vpop.f32.mrf.mxu0  ;;  %v1029_v26 = vpop.f32.mrf.mxu1  ;;  %v1054_v15 = vadd.f32 %v1053_v42, %v2745_v55 }
 0x363   :  { %v1800_v41 = vmul.f32 -1.442695, %v1041_v12 }
 0x364   :  { %v1921_v20 = vpop.eup %1920 }
 0x365   :  { %v1923_v19 = vpop.eup %1922  ;;  %v1066_v8 = vadd.f32 1.0, %v1921_v20  ;;  %1924 = vpow2.f32 %v1800_v41 }
 0x366   :  { %v1067_v1 = vadd.f32 1.0, %v1923_v19 }
 0x367   :  { %1926 = vrcp.f32 %v1066_v8  ;;  %v1080_v58 = vand.u32 2147483648, %v1066_v8  ;;  %v1078_v59 = vand.u32 2147483647, %v1066_v8  ;;  %vm1074_vm15 = vweird.f32 %v1066_v8 }
 0x368   :  { %1928 = vrcp.f32 %v1067_v1  ;;  %v1042_v36 = vpop.f32.mrf.mxu2  ;;  %v1055_v61 = vpop.f32.mrf.mxu3  ;;  %v1095_v56 = vand.u32 2147483648, %v1067_v1  ;;  %v1093_v34 = vand.u32 2147483647, %v1067_v1  ;;  %vm1089_vm3 = vweird.f32 %v1067_v1 }
 0x369   :  { %v1081_v26 = vor.u32 1.1754944e-38, %v1080_v58  ;;  %vm1079_vm6 = vcmp.eq.f32.partialorder %v1078_v59, 8.507059e+37 }
 0x36a   :  { %v1096_v20 = vor.u32 1.1754944e-38, %v1095_v56  ;;  %vm1094_vm7 = vcmp.eq.f32.partialorder %v1093_v34, 8.507059e+37  ;;  %v2746_v34 = vld [vmem:[#allocation24_spill] sm:$0xff] }
 0x36b   :  { %v1925_v30 = vpop.eup %1924 }
 0x36c   :  { %v1068_v32 = vadd.f32 1.0, %v1925_v30 }
 0x36d   :  { %v1927_v52 = vpop.eup %1926 }
 0x36e   :  { %v1929_v48 = vpop.eup %1928  ;;  %v1070_v46 = vmul.f32 %v1927_v52, %v1066_v8  ;;  %1930 = vrcp.f32 %v1068_v32  ;;  %vm1075_vm13 = vweird.f32 %v1927_v52  ;;  %vm1104_vm9 = vweird.f32 %v1068_v32 }
 0x36f   :  { %v1085_v10 = vmul.f32 %v1929_v48, %v1067_v1  ;;  %1932 = vtanh.f32 %v1054_v15  ;;  %vm1090_vm14 = vweird.f32 %v1929_v48  ;;  %vm1076_vm4 = vmor %vm1074_vm15, %vm1075_vm13 }
 0x370   :  { %v1071_v11 = vsub.f32 1.0, %v1070_v46  ;;  %vm1091_vm5 = vmor %vm1089_vm3, %vm1090_vm14 }
 0x371   :  { %v1086_v45 = vsub.f32 1.0, %v1085_v10 }
 0x372   :  { %v1072_v49 = vmul.f32 %v1927_v52, %v1071_v11 }
 0x373   :  { %v1087_v38 = vmul.f32 %v1929_v48, %v1086_v45  ;;  %v1110_v45 = vand.u32 2147483648, %v1068_v32 }
 0x374   :  { %v1931_v12 = vpop.eup %1930  ;;  %v1073_v28 = vadd.f32 %v1927_v52, %v1072_v49 }
 0x375   :  { %v1100_v42 = vmul.f32 %v1931_v12, %v1068_v32  ;;  %v1088_v41 = vadd.f32 %v1929_v48, %v1087_v38  ;;  %v1933_v36 = vpop.eup %1932  ;;  %vm1105_vm8 = vweird.f32 %v1931_v12  ;;  %v1111_v56 = vor.u32 1.1754944e-38, %v1110_v45 }
 0x376   :  { %v1077_v19 = vsel %vm1076_vm4, %v1927_v52, %v1073_v28  ;;  %v1108_v52 = vand.u32 2147483647, %v1068_v32  ;;  %vm1106_vm10 = vmor %vm1104_vm9, %vm1105_vm8  ;;  %v2747_v28 = vld [vmem:[#allocation25_spill] sm:$0xff] }
 0x377   :  { %v1101_v61 = vsub.f32 1.0, %v1100_v42  ;;  %v1082_v30 = vsel %vm1079_vm6, %v1081_v26, %v1077_v19  ;;  %v1092_v55 = vsel %vm1091_vm5, %v1929_v48, %v1088_v41 }
 0x378   :  { %v1097_v15 = vsel %vm1094_vm7, %v1096_v20, %v1092_v55  ;;  %v1116_v46 = vmul.f32 %v1933_v36, %v1082_v30  ;;  %vm1109_vm11 = vcmp.eq.f32.partialorder %v1108_v52, 8.507059e+37  ;;  %v2748_v36 = vld [vmem:[#allocation26_spill] sm:$0xff] }
 0x379   :  { %v1115_v10 = vmul.f32 %v1097_v15, %v2551_v29  ;;  %v1102_v11 = vmul.f32 %v1931_v12, %v1101_v61 }
 0x37b   :  { %v2591_v8 = vadd.f32 %v1116_v46, %v1115_v10  ;;  %v1103_v1 = vadd.f32 %v1931_v12, %v1102_v11 }
 0x37d   :  { %1934 = vtanh.f32 %v2591_v8  ;;  %v1107_v58 = vsel %vm1106_vm10, %v1931_v12, %v1103_v1 }
 0x37e   :  { %v1112_v49 = vsel %vm1109_vm11, %v1111_v56, %v1107_v58 }
 0x383   :  { %v1935_v48 = vpop.eup %1934 }
 0x384   :  { %v1119_v59 = vmul.f32 %v1935_v48, %v1112_v49  ;;  %v2749_v49 = vld [vmem:[#allocation27_spill] sm:$0xff] }
 0x386   :  { %v1120_v38 = vpack.c.bf16 %v1119_v59, %v1119_v59 }
 0x388   :  { %1141 = vmatmul.bf16.vlgmr.msrb.gmra.mxu0 %v1120_v38  ;;  %1154 = vmatmul.bf16.vlgmr.msrb.gmra.mxu1 %v1120_v38 }
 0x389   :  { %1167 = vmatmul.bf16.vlgmr.msrb.gmra.mxu2 %v1120_v38  ;;  %1180 = vmatmul.bf16.vlgmr.msrb.gmra.mxu3 %v1120_v38 }
 0x38a   :  { %1389 = vmatpush.bf16.msrb.mxu0 %v2079_v5  ;;  %1402 = vmatpush.bf16.msrb.mxu1 %v2081_v9 }
 0x38b   :  { %1415 = vmatpush.bf16.msrb.mxu2 %v2084_v13  ;;  %1428 = vmatpush.bf16.msrb.mxu3 %v2086_v14 }
 0x38e   :  { %1390 = vmatpush.bf16.msrb.mxu0 %v2089_v18  ;;  %1403 = vmatpush.bf16.msrb.mxu1 %v2093_v22 }
 0x38f   :  { %1416 = vmatpush.bf16.msrb.mxu2 %v2095_v23  ;;  %1429 = vmatpush.bf16.msrb.mxu3 %v2100_v27 }
 0x392   :  { %1391 = vmatpush.bf16.msrb.mxu0 %v2103_v31  ;;  %1404 = vmatpush.bf16.msrb.mxu1 %v2106_v35 }
 0x393   :  { %1417 = vmatpush.bf16.msrb.mxu2 %v2110_v39  ;;  %1430 = vmatpush.bf16.msrb.mxu3 %v2112_v40 }
 0x396   :  { %1392 = vmatpush.bf16.msrb.mxu0 %v2115_v47  ;;  %1405 = vmatpush.bf16.msrb.mxu1 %v2121_v50 }
 0x397   :  { %1418 = vmatpush.bf16.msrb.mxu2 %v2125_v53  ;;  %1431 = vmatpush.bf16.msrb.mxu3 %v2127_v54 }
 0x39a   :  { %1393 = vmatpush.bf16.msrb.mxu0 %v2133_v62  ;;  %1406 = vmatpush.bf16.msrb.mxu1 %v2136_v63 }
 0x39b   :  { %1419 = vmatpush.bf16.msrb.mxu2 %v2140_v4  ;;  %1432 = vmatpush.bf16.msrb.mxu3 %v2142_v6 }
 0x39e   :  { %1394 = vmatpush.bf16.msrb.mxu0 %v2148_v16  ;;  %1407 = vmatpush.bf16.msrb.mxu1 %v2151_v17 }
 0x39f   :  { %1420 = vmatpush.bf16.msrb.mxu2 %v2155_v21  ;;  %1433 = vmatpush.bf16.msrb.mxu3 %v2157_v24 }
 0x3a2   :  { %1395 = vmatpush.bf16.msrb.mxu0 %v2160_v33  ;;  %1408 = vmatpush.bf16.msrb.mxu1 %v2166_v37 }
 0x3a3   :  { %1421 = vmatpush.bf16.msrb.mxu2 %v2170_v43  ;;  %1434 = vmatpush.bf16.msrb.mxu3 %v2172_v44 }
 0x3a6   :  { %1396 = vmatpush.bf16.msrb.mxu0 %v2175_v51  ;;  %1409 = vmatpush.bf16.msrb.mxu1 %v2729_v7 }
 0x3a7   :  { %1422 = vmatpush.bf16.msrb.mxu2 %v2730_v57  ;;  %1435 = vmatpush.bf16.msrb.mxu3 %v2731_v25 }
 0x405   :  { %v1142_v29 = vpop.f32.mrf.mxu0  ;;  %v1155_v32 = vpop.f32.mrf.mxu1 }
 0x406   :  { %v1143_v12 = vadd.f32 %v1142_v29, %v2746_v34  ;;  %v1156_v42 = vadd.f32 %v1155_v32, %v2747_v28 }
 0x408   :  { %v1801_v26 = vmul.f32 -1.442695, %v1143_v12  ;;  %v1802_v41 = vmul.f32 -1.442695, %v1156_v42 }
 0x40a   :  { %1936 = vpow2.f32 %v1801_v26 }
 0x40b   :  { %1938 = vpow2.f32 %v1802_v41 }
 0x40c   :  { %v1168_v20 = vpop.f32.mrf.mxu2  ;;  %v1181_v19 = vpop.f32.mrf.mxu3 }
 0x40d   :  { %v1169_v61 = vadd.f32 %v1168_v20, %v2748_v36  ;;  %v1144_v30 = vpop.f32.mrf.mxu0  ;;  %v1157_v55 = vpop.f32.mrf.mxu1  ;;  %v1182_v59 = vadd.f32 %v1181_v19, %v2749_v49 }
 0x40f   :  { %v1803_v15 = vmul.f32 -1.442695, %v1169_v61 }
 0x410   :  { %v1937_v46 = vpop.eup %1936 }
 0x411   :  { %v1939_v10 = vpop.eup %1938  ;;  %v1194_v11 = vadd.f32 1.0, %v1937_v46  ;;  %1940 = vpow2.f32 %v1803_v15 }
 0x412   :  { %v1195_v1 = vadd.f32 1.0, %v1939_v10 }
 0x413   :  { %1942 = vrcp.f32 %v1194_v11  ;;  %v1208_v28 = vand.u32 2147483648, %v1194_v11  ;;  %v1206_v41 = vand.u32 2147483647, %v1194_v11  ;;  %vm1202_vm14 = vweird.f32 %v1194_v11 }
 0x414   :  { %1944 = vrcp.f32 %v1195_v1  ;;  %v1170_v45 = vpop.f32.mrf.mxu2  ;;  %v1183_v52 = vpop.f32.mrf.mxu3  ;;  %v1223_v42 = vand.u32 2147483648, %v1195_v1  ;;  %v1221_v36 = vand.u32 2147483647, %v1195_v1  ;;  %vm1217_vm15 = vweird.f32 %v1195_v1 }
 0x415   :  { %v1209_v55 = vor.u32 1.1754944e-38, %v1208_v28  ;;  %vm1207_vm5 = vcmp.eq.f32.partialorder %v1206_v41, 8.507059e+37 }
 0x416   :  { %v1224_v46 = vor.u32 1.1754944e-38, %v1223_v42  ;;  %vm1222_vm6 = vcmp.eq.f32.partialorder %v1221_v36, 8.507059e+37 }
 0x417   :  { %v1941_v58 = vpop.eup %1940 }
 0x418   :  { %v1196_v56 = vadd.f32 1.0, %v1941_v58 }
 0x419   :  { %v1943_v48 = vpop.eup %1942 }
 0x41a   :  { %v1945_v38 = vpop.eup %1944  ;;  %v1198_v29 = vmul.f32 %v1943_v48, %v1194_v11  ;;  %1946 = vrcp.f32 %v1196_v56  ;;  %vm1203_vm12 = vweird.f32 %v1943_v48  ;;  %vm1232_vm8 = vweird.f32 %v1196_v56 }
 0x41b   :  { %v1213_v32 = vmul.f32 %v1945_v38, %v1195_v1  ;;  %1948 = vtanh.f32 %v1182_v59  ;;  %vm1218_vm13 = vweird.f32 %v1945_v38  ;;  %vm1204_vm3 = vmor %vm1202_vm14, %vm1203_vm12 }
 0x41c   :  { %v1199_v34 = vsub.f32 1.0, %v1198_v29  ;;  %vm1219_vm4 = vmor %vm1217_vm15, %vm1218_vm13 }
 0x41d   :  { %v1214_v12 = vsub.f32 1.0, %v1213_v32 }
 0x41e   :  { %v1200_v26 = vmul.f32 %v1943_v48, %v1199_v34 }
 0x41f   :  { %v1215_v20 = vmul.f32 %v1945_v38, %v1214_v12  ;;  %v1238_v12 = vand.u32 2147483648, %v1196_v56 }
 0x420   :  { %v1947_v61 = vpop.eup %1946  ;;  %v1201_v30 = vadd.f32 %v1943_v48, %v1200_v26 }
 0x421   :  { %v1228_v19 = vmul.f32 %v1947_v61, %v1196_v56  ;;  %v1216_v15 = vadd.f32 %v1945_v38, %v1215_v20  ;;  %v1949_v45 = vpop.eup %1948  ;;  %vm1233_vm7 = vweird.f32 %v1947_v61  ;;  %v1239_v42 = vor.u32 1.1754944e-38, %v1238_v12 }
 0x422   :  { %v1205_v10 = vsel %vm1204_vm3, %v1943_v48, %v1201_v30  ;;  %v1236_v48 = vand.u32 2147483647, %v1196_v56  ;;  %vm1234_vm9 = vmor %vm1232_vm8, %vm1233_vm7 }
 0x423   :  { %v1229_v52 = vsub.f32 1.0, %v1228_v19  ;;  %v1210_v58 = vsel %vm1207_vm5, %v1209_v55, %v1205_v10  ;;  %v1220_v49 = vsel %vm1219_vm4, %v1945_v38, %v1216_v15 }
 0x424   :  { %v1225_v59 = vsel %vm1222_vm6, %v1224_v46, %v1220_v49  ;;  %v1244_v29 = vmul.f32 %v1949_v45, %v1210_v58  ;;  %vm1237_vm10 = vcmp.eq.f32.partialorder %v1236_v48, 8.507059e+37 }
 0x425   :  { %v1243_v32 = vmul.f32 %v1225_v59, %v2591_v8  ;;  %v1230_v34 = vmul.f32 %v1947_v61, %v1229_v52 }
 0x427   :  { %v2631_v11 = vadd.f32 %v1244_v29, %v1243_v32  ;;  %v1231_v1 = vadd.f32 %v1947_v61, %v1230_v34 }
 0x429   :  { %1950 = vtanh.f32 %v2631_v11  ;;  %v1235_v28 = vsel %vm1234_vm9, %v1947_v61, %v1231_v1 }
 0x42a   :  { %v1240_v26 = vsel %vm1237_vm10, %v1239_v42, %v1235_v28 }
 0x42f   :  { %v1951_v38 = vpop.eup %1950 }
 0x430   :  { %v1247_v41 = vmul.f32 %v1951_v38, %v1240_v26  ;;  %v1382_v38 = vld.sshfl [vmem:[#allocation1 + $0x8] sm:$0xff pattern:$0x73625140] }
 0x432   :  { %v1248_v20 = vpack.c.bf16 %v1247_v41, %v1247_v41 }
 0x434   :  { %1269 = vmatmul.bf16.vlgmr.msra.gmra.mxu0 %v1248_v20  ;;  %1282 = vmatmul.bf16.vlgmr.msra.gmra.mxu1 %v1248_v20 }
 0x435   :  { %1295 = vmatmul.bf16.vlgmr.msra.gmra.mxu2 %v1248_v20  ;;  %1308 = vmatmul.bf16.vlgmr.msra.gmra.mxu3 %v1248_v20 }
 0x436   :  { %1516 = vmatpush.bf16.msra.mxu0 %v2079_v5  ;;  %1529 = vmatpush.bf16.msra.mxu1 %v2081_v9 }
 0x437   :  { %1542 = vmatpush.bf16.msra.mxu2 %v2084_v13  ;;  %1555 = vmatpush.bf16.msra.mxu3 %v2086_v14 }
 0x43a   :  { %1517 = vmatpush.bf16.msra.mxu0 %v2089_v18  ;;  %1530 = vmatpush.bf16.msra.mxu1 %v2093_v22 }
 0x43b   :  { %1543 = vmatpush.bf16.msra.mxu2 %v2095_v23  ;;  %1556 = vmatpush.bf16.msra.mxu3 %v2100_v27 }
 0x43e   :  { %1518 = vmatpush.bf16.msra.mxu0 %v2103_v31  ;;  %1531 = vmatpush.bf16.msra.mxu1 %v2106_v35 }
 0x43f   :  { %1544 = vmatpush.bf16.msra.mxu2 %v2110_v39  ;;  %1557 = vmatpush.bf16.msra.mxu3 %v2112_v40 }
 0x442   :  { %1519 = vmatpush.bf16.msra.mxu0 %v2115_v47  ;;  %1532 = vmatpush.bf16.msra.mxu1 %v2121_v50 }
 0x443   :  { %1545 = vmatpush.bf16.msra.mxu2 %v2125_v53  ;;  %1558 = vmatpush.bf16.msra.mxu3 %v2127_v54 }
 0x446   :  { %1520 = vmatpush.bf16.msra.mxu0 %v2133_v62  ;;  %1533 = vmatpush.bf16.msra.mxu1 %v2136_v63 }
 0x447   :  { %1546 = vmatpush.bf16.msra.mxu2 %v2140_v4  ;;  %1559 = vmatpush.bf16.msra.mxu3 %v2142_v6 }
 0x44a   :  { %1521 = vmatpush.bf16.msra.mxu0 %v2148_v16  ;;  %1534 = vmatpush.bf16.msra.mxu1 %v2151_v17 }
 0x44b   :  { %1547 = vmatpush.bf16.msra.mxu2 %v2155_v21  ;;  %1560 = vmatpush.bf16.msra.mxu3 %v2157_v24 }
 0x44e   :  { %1522 = vmatpush.bf16.msra.mxu0 %v2160_v33  ;;  %1535 = vmatpush.bf16.msra.mxu1 %v2166_v37 }
 0x44f   :  { %1548 = vmatpush.bf16.msra.mxu2 %v2170_v43  ;;  %1561 = vmatpush.bf16.msra.mxu3 %v2172_v44 }
 0x452   :  { %1523 = vmatpush.bf16.msra.mxu0 %v2175_v51  ;;  %1536 = vmatpush.bf16.msra.mxu1 %v2729_v7 }
 0x453   :  { %1549 = vmatpush.bf16.msra.mxu2 %v2730_v57  ;;  %1562 = vmatpush.bf16.msra.mxu3 %v2731_v25 }
 0x4b1   :  { %v1270_v5 = vpop.f32.mrf.mxu0  ;;  %v1283_v9 = vpop.f32.mrf.mxu1 }
 0x4b2   :  { %v1271_v13 = vadd.f32 %v1270_v5, %v2497_v60  ;;  %v1284_v14 = vadd.f32 %v1283_v9, %v2500_v0 }
 0x4b4   :  { %v1804_v18 = vmul.f32 -1.442695, %v1271_v13  ;;  %v1805_v22 = vmul.f32 -1.442695, %v1284_v14 }
 0x4b5   :  { %v1383_v13 = vld.sshfl [vmem:[#allocation1 + $0x10] sm:$0xff pattern:$0x73625140] }
 0x4b6   :  { %1952 = vpow2.f32 %v1804_v18 }
 0x4b7   :  { %1954 = vpow2.f32 %v1805_v22 }
 0x4b8   :  { %v1296_v23 = vpop.f32.mrf.mxu2  ;;  %v1309_v27 = vpop.f32.mrf.mxu3 }
 0x4b9   :  { %v1297_v31 = vadd.f32 %v1296_v23, %v2502_v2  ;;  %v1272_v35 = vpop.f32.mrf.mxu0  ;;  %v1285_v39 = vpop.f32.mrf.mxu1  ;;  %v1310_v17 = vadd.f32 %v1309_v27, %v2504_v3 }
 0x4bb   :  { %v1806_v40 = vmul.f32 -1.442695, %v1297_v31 }
 0x4bc   :  { %v1953_v47 = vpop.eup %1952 }
 0x4bd   :  { %v1955_v50 = vpop.eup %1954  ;;  %v1322_v53 = vadd.f32 1.0, %v1953_v47  ;;  %1956 = vpow2.f32 %v1806_v40 }
 0x4be   :  { %v1323_v54 = vadd.f32 1.0, %v1955_v50 }
 0x4bf   :  { %1958 = vrcp.f32 %v1322_v53  ;;  %v1336_v44 = vand.u32 2147483648, %v1322_v53  ;;  %v1334_v57 = vand.u32 2147483647, %v1322_v53  ;;  %vm1330_vm13 = vweird.f32 %v1322_v53 }
 0x4c0   :  { %1960 = vrcp.f32 %v1323_v54  ;;  %v1298_v62 = vpop.f32.mrf.mxu2  ;;  %v1311_v63 = vpop.f32.mrf.mxu3  ;;  %v1351_v51 = vand.u32 2147483648, %v1323_v54  ;;  %v1349_v60 = vand.u32 2147483647, %v1323_v54  ;;  %vm1345_vm14 = vweird.f32 %v1323_v54 }
 0x4c1   :  { %v1337_v8 = vor.u32 1.1754944e-38, %v1336_v44  ;;  %vm1335_vm4 = vcmp.eq.f32.partialorder %v1334_v57, 8.507059e+37  ;;  %v273_v62 = vld [vmem:[%s2695_s2] sm:$0xf] }
 0x4c2   :  { %v1352_v36 = vor.u32 1.1754944e-38, %v1351_v51  ;;  %vm1350_vm5 = vcmp.eq.f32.partialorder %v1349_v60, 8.507059e+37  ;;  %v276_v63 = vperm.slane %v273_v62, 1 }
 0x4c3   :  { %v1957_v4 = vpop.eup %1956 }
 0x4c4   :  { %v1324_v6 = vadd.f32 1.0, %v1957_v4 }
 0x4c5   :  { %v1959_v16 = vpop.eup %1958 }
 0x4c6   :  { %v1961_v21 = vpop.eup %1960  ;;  %v1326_v24 = vmul.f32 %v1959_v16, %v1322_v53  ;;  %1962 = vrcp.f32 %v1324_v6  ;;  %vm1331_vm11 = vweird.f32 %v1959_v16  ;;  %v1366_v59 = vand.u32 2147483648, %v1324_v6 }
 0x4c7   :  { %v1341_v33 = vmul.f32 %v1961_v21, %v1323_v54  ;;  %1964 = vtanh.f32 %v1310_v17  ;;  %vm1346_vm12 = vweird.f32 %v1961_v21  ;;  %vm1332_vm15 = vmor %vm1330_vm13, %vm1331_vm11  ;;  %vm1360_vm7 = vweird.f32 %v1324_v6  ;;  %v1854_v54 = vld [vmem:[%s2697_s4] ss:$0 sm:$0xff] }
 0x4c8   :  { %v1327_v37 = vsub.f32 1.0, %v1326_v24  ;;  %vm1347_vm3 = vmor %vm1345_vm14, %vm1346_vm12  ;;  %v1364_v29 = vand.u32 2147483647, %v1324_v6  ;;  %v1367_v34 = vor.u32 1.1754944e-38, %v1366_v59  ;;  %1634 = vrot.lane.b32.xlu2 %v1854_v54, %s2031_s26  ;;  %v275_v24 = vperm.slane %v273_v62, 0 }
 0x4c9   :  { %v1342_v43 = vsub.f32 1.0, %v1341_v33  ;;  %v279_v33 = vrot.slane %v276_v63, 6 }
 0x4ca   :  { %v1328_v7 = vmul.f32 %v1959_v16, %v1327_v37  ;;  %vm1365_vm9 = vcmp.eq.f32.partialorder %v1364_v29, 8.507059e+37 }
 0x4cb   :  { %v1343_v25 = vmul.f32 %v1961_v21, %v1342_v43 }
 0x4cc   :  { %v1963_v0 = vpop.eup %1962  ;;  %v1329_v2 = vadd.f32 %v1959_v16, %v1328_v7 }
 0x4cd   :  { %v1356_v3 = vmul.f32 %v1963_v0, %v1324_v6  ;;  %v1344_v56 = vadd.f32 %v1961_v21, %v1343_v25  ;;  %v1965_v30 = vpop.eup %1964  ;;  %vm1361_vm6 = vweird.f32 %v1963_v0  ;;  %v277_v6 = vperm.slane %v273_v62, 2 }
 0x4ce   :  { %v1333_v61 = vsel %vm1332_vm15, %v1959_v16, %v1329_v2  ;;  %vm1362_vm8 = vmor %vm1360_vm7, %vm1361_vm6  ;;  %v278_v16 = vperm.slane %v273_v62, 3 }
 0x4cf   :  { %v1357_v19 = vsub.f32 1.0, %v1356_v3  ;;  %v1338_v55 = vsel %vm1335_vm4, %v1337_v8, %v1333_v61  ;;  %v1348_v15 = vsel %vm1347_vm3, %v1961_v21, %v1344_v56  ;;  %v1384_v21 = vld.sshfl [vmem:[#allocation1 + $0x18] sm:$0xff pattern:$0x73625140]  ;;  %v280_v44 = vrot.slane %v277_v6, 4 }
 0x4d0   :  { %v1353_v46 = vsel %vm1350_vm5, %v1352_v36, %v1348_v15  ;;  %v1372_v10 = vmul.f32 %v1965_v30, %v1338_v55  ;;  %v281_v51 = vrot.slane %v278_v16, 2 }
 0x4d1   :  { %v1371_v45 = vmul.f32 %v1353_v46, %v2631_v11  ;;  %v1358_v52 = vmul.f32 %v1963_v0, %v1357_v19  ;;  %v1381_v11 = vld.sshfl [vmem:[#allocation1] sm:$0xff pattern:$0x73625140] }
 0x4d2   :  { %v283_v2 = vsel %vm232_vm1, %v280_v44, %v281_v51 }
 0x4d3   :  { %v2671_v58 = vadd.f32 %v1372_v10, %v1371_v45  ;;  %v1359_v49 = vadd.f32 %v1963_v0, %v1358_v52 }
 0x4d5   :  { %1966 = vtanh.f32 %v2671_v58  ;;  %v1363_v32 = vsel %vm1362_vm8, %v1963_v0, %v1359_v49  ;;  %v282_v0 = vsel %vm230_vm0, %v275_v24, %v279_v33 }
 0x4d6   :  { %v1368_v12 = vsel %vm1365_vm9, %v1367_v34, %v1363_v32  ;;  %v284_v56 = vsel %vm234_vm2, %v282_v0, %v283_v2 }
 0x4d7   :  { %1507 = vst [vmem:[#allocation1] ss:$4 sm:$0xff] %v284_v56 }
 0x4db   :  { %v1967_v1 = vpop.eup %1966 }
 0x4dc   :  { %v1375_v48 = vmul.f32 %v1967_v1, %v1368_v12 }
 0x4de   :  { %v1376_v28 = vpack.c.bf16 %v1375_v48, %v1375_v48 }
 0x4e0   :  { %1397 = vmatmul.bf16.vlgmr.msrb.gmra.mxu0 %v1376_v28  ;;  %1410 = vmatmul.bf16.vlgmr.msrb.gmra.mxu1 %v1376_v28 }
 0x4e1   :  { %1423 = vmatmul.bf16.vlgmr.msrb.gmra.mxu2 %v1376_v28  ;;  %1436 = vmatmul.bf16.vlgmr.msrb.gmra.mxu3 %v1376_v28 }
 0x55d   :  { %v1398_v42 = vpop.f32.mrf.mxu0  ;;  %v1411_v26 = vpop.f32.mrf.mxu1 }
 0x55e   :  { %v1399_v41 = vadd.f32 %v1398_v42, %v1381_v11  ;;  %v1412_v20 = vadd.f32 %v1411_v26, %v1382_v38 }
 0x560   :  { %v1807_v5 = vmul.f32 -1.442695, %v1399_v41  ;;  %v1808_v9 = vmul.f32 -1.442695, %v1412_v20 }
 0x562   :  { %1968 = vpow2.f32 %v1807_v5 }
 0x563   :  { %1970 = vpow2.f32 %v1808_v9 }
 0x564   :  { %v1424_v14 = vpop.f32.mrf.mxu2  ;;  %v1437_v18 = vpop.f32.mrf.mxu3 }
 0x565   :  { %v1425_v22 = vadd.f32 %v1424_v14, %v1383_v13  ;;  %v1400_v23 = vpop.f32.mrf.mxu0  ;;  %v1413_v27 = vpop.f32.mrf.mxu1  ;;  %v1438_v43 = vadd.f32 %v1437_v18, %v1384_v21 }
 0x567   :  { %v1809_v31 = vmul.f32 -1.442695, %v1425_v22  ;;  %v1509_v22 = vld.sshfl [vmem:[#allocation1 + $0x8] sm:$0xff pattern:$0x73625140] }
 0x568   :  { %v1969_v35 = vpop.eup %1968 }
 0x569   :  { %v1971_v39 = vpop.eup %1970  ;;  %v1450_v40 = vadd.f32 1.0, %v1969_v35  ;;  %1972 = vpow2.f32 %v1809_v31 }
 0x56a   :  { %v1451_v47 = vadd.f32 1.0, %v1971_v39 }
 0x56b   :  { %1974 = vrcp.f32 %v1450_v40  ;;  %v1464_v8 = vand.u32 2147483648, %v1450_v40  ;;  %v1462_v30 = vand.u32 2147483647, %v1450_v40  ;;  %vm1458_vm12 = vweird.f32 %v1450_v40 }
 0x56c   :  { %1976 = vrcp.f32 %v1451_v47  ;;  %v1426_v50 = vpop.f32.mrf.mxu2  ;;  %v1439_v53 = vpop.f32.mrf.mxu3  ;;  %v1479_v36 = vand.u32 2147483648, %v1451_v47  ;;  %v1477_v55 = vand.u32 2147483647, %v1451_v47  ;;  %vm1473_vm13 = vweird.f32 %v1451_v47 }
 0x56d   :  { %v1465_v45 = vor.u32 1.1754944e-38, %v1464_v8  ;;  %vm1463_vm2 = vcmp.eq.f32.partialorder %v1462_v30, 8.507059e+37 }
 0x56e   :  { %v1480_v49 = vor.u32 1.1754944e-38, %v1479_v36  ;;  %vm1478_vm14 = vcmp.eq.f32.partialorder %v1477_v55, 8.507059e+37 }
 0x56f   :  { %v1973_v4 = vpop.eup %1972 }
 0x570   :  { %v1452_v17 = vadd.f32 1.0, %v1973_v4 }
 0x571   :  { %v1975_v37 = vpop.eup %1974 }
 0x572   :  { %v1977_v7 = vpop.eup %1976  ;;  %v1454_v57 = vmul.f32 %v1975_v37, %v1450_v40  ;;  %1978 = vrcp.f32 %v1452_v17  ;;  %vm1459_vm10 = vweird.f32 %v1975_v37  ;;  %v1494_v26 = vand.u32 2147483648, %v1452_v17 }
 0x573   :  { %v1469_v25 = vmul.f32 %v1977_v7, %v1451_v47  ;;  %1980 = vtanh.f32 %v1438_v43  ;;  %vm1474_vm11 = vweird.f32 %v1977_v7  ;;  %vm1460_vm0 = vmor %vm1458_vm12, %vm1459_vm10  ;;  %vm1488_vm3 = vweird.f32 %v1452_v17  ;;  %v1510_v47 = vld.sshfl [vmem:[#allocation1 + $0x10] sm:$0xff pattern:$0x73625140] }
 0x574   :  { %v1455_v60 = vsub.f32 1.0, %v1454_v57  ;;  %vm1475_vm1 = vmor %vm1473_vm13, %vm1474_vm11  ;;  %v1492_v41 = vand.u32 2147483647, %v1452_v17  ;;  %v1495_v5 = vor.u32 1.1754944e-38, %v1494_v26 }
 0x575   :  { %v1470_v3 = vsub.f32 1.0, %v1469_v25 }
 0x576   :  { %v1456_v61 = vmul.f32 %v1975_v37, %v1455_v60  ;;  %vm1493_vm5 = vcmp.eq.f32.partialorder %v1492_v41, 8.507059e+37 }
 0x577   :  { %v1471_v19 = vmul.f32 %v1977_v7, %v1470_v3 }
 0x578   :  { %v1979_v15 = vpop.eup %1978  ;;  %v1457_v46 = vadd.f32 %v1975_v37, %v1456_v61 }
 0x579   :  { %v1484_v10 = vmul.f32 %v1979_v15, %v1452_v17  ;;  %v1472_v52 = vadd.f32 %v1977_v7, %v1471_v19  ;;  %v1981_v29 = vpop.eup %1980  ;;  %vm1489_vm15 = vweird.f32 %v1979_v15 }
 0x57a   :  { %v1461_v59 = vsel %vm1460_vm0, %v1975_v37, %v1457_v46  ;;  %vm1490_vm4 = vmor %vm1488_vm3, %vm1489_vm15  ;;  %v1511_v37 = vld.sshfl [vmem:[#allocation1 + $0x18] sm:$0xff pattern:$0x73625140]  ;;  %vm1642_vm15 = vcmask 517120   ;;  %vm1651_vm3 = vcmask 1024  }
 0x57b   :  { %v1485_v32 = vsub.f32 1.0, %v1484_v10  ;;  %v1466_v34 = vsel %vm1463_vm2, %v1465_v45, %v1461_v59  ;;  %v1476_v1 = vsel %vm1475_vm1, %v1977_v7, %v1472_v52 }
 0x57c   :  { %v1481_v12 = vsel %vm1478_vm14, %v1480_v49, %v1476_v1  ;;  %v1500_v48 = vmul.f32 %v1981_v29, %v1466_v34 }
 0x57d   :  { %v1499_v28 = vmul.f32 %v1481_v12, %v2671_v58  ;;  %v1486_v11 = vmul.f32 %v1979_v15, %v1485_v32  ;;  %v1508_v58 = vld.sshfl [vmem:[#allocation1] sm:$0xff pattern:$0x73625140] }
 0x57f   :  { %v2685_v42 = vadd.f32 %v1500_v48, %v1499_v28  ;;  %v1487_v38 = vadd.f32 %v1979_v15, %v1486_v11 }
 0x581   :  { %1982 = vtanh.f32 %v2685_v42  ;;  %v1491_v20 = vsel %vm1490_vm4, %v1979_v15, %v1487_v38 }
 0x582   :  { %v1496_v13 = vsel %vm1493_vm5, %v1495_v5, %v1491_v20 }
 0x587   :  { %v1983_v9 = vpop.eup %1982 }
 0x588   :  { %v1503_v14 = vmul.f32 %v1983_v9, %v1496_v13  ;;  %v1635_v9 = vpop.permute.xlu2 %1634 }
 0x58a   :  { %v1504_v18 = vpack.c.bf16 %v1503_v14, %v1503_v14 }
 0x58c   :  { %1524 = vmatmul.bf16.vlgmr.msra.gmra.mxu0 %v1504_v18  ;;  %1537 = vmatmul.bf16.vlgmr.msra.gmra.mxu1 %v1504_v18 }
 0x58d   :  { %1550 = vmatmul.bf16.vlgmr.msra.gmra.mxu2 %v1504_v18  ;;  %1563 = vmatmul.bf16.vlgmr.msra.gmra.mxu3 %v1504_v18 }
 0x609   :  { %v1525_v23 = vpop.f32.mrf.mxu0  ;;  %v1538_v27 = vpop.f32.mrf.mxu1 }
 0x60a   :  { %v1526_v31 = vadd.f32 %v1525_v23, %v1508_v58  ;;  %v1539_v35 = vadd.f32 %v1538_v27, %v1509_v22  ;;  %v1855_v22 = vld [vmem:[#allocation3] ss:$0 sm:$0xff] }
 0x60c   :  { %v1810_v39 = vmul.f32 -1.442695, %v1526_v31  ;;  %v1811_v40 = vmul.f32 -1.442695, %v1539_v35 }
 0x60e   :  { %1984 = vpow2.f32 %v1810_v39 }
 0x60f   :  { %1986 = vpow2.f32 %v1811_v40 }
 0x610   :  { %v1551_v50 = vpop.f32.mrf.mxu2  ;;  %v1564_v53 = vpop.f32.mrf.mxu3 }
 0x611   :  { %v1552_v54 = vadd.f32 %v1551_v50, %v1510_v47  ;;  %v1527_v62 = vpop.f32.mrf.mxu0  ;;  %v1540_v63 = vpop.f32.mrf.mxu1  ;;  %v1565_v7 = vadd.f32 %v1564_v53, %v1511_v37 }
 0x613   :  { %v1812_v4 = vmul.f32 -1.442695, %v1552_v54 }
 0x614   :  { %v1985_v6 = vpop.eup %1984 }
 0x615   :  { %v1987_v16 = vpop.eup %1986  ;;  %v1577_v17 = vadd.f32 1.0, %v1985_v6  ;;  %1988 = vpow2.f32 %v1812_v4 }
 0x616   :  { %v1578_v21 = vadd.f32 1.0, %v1987_v16 }
 0x617   :  { %1990 = vrcp.f32 %v1577_v17  ;;  %v1591_v3 = vand.u32 2147483648, %v1577_v17  ;;  %v1589_v36 = vand.u32 2147483647, %v1577_v17  ;;  %vm1585_vm8 = vweird.f32 %v1577_v17 }
 0x618   :  { %1992 = vrcp.f32 %v1578_v21  ;;  %v1553_v24 = vpop.f32.mrf.mxu2  ;;  %v1566_v33 = vpop.f32.mrf.mxu3  ;;  %v1606_v8 = vand.u32 2147483648, %v1578_v21  ;;  %v1604_v30 = vand.u32 2147483647, %v1578_v21  ;;  %vm1600_vm9 = vweird.f32 %v1578_v21 }
 0x619   :  { %v1592_v15 = vor.u32 1.1754944e-38, %v1591_v3  ;;  %vm1590_vm12 = vcmp.eq.f32.partialorder %v1589_v36, 8.507059e+37 }
 0x61a   :  { %v1607_v45 = vor.u32 1.1754944e-38, %v1606_v8  ;;  %vm1605_vm13 = vcmp.eq.f32.partialorder %v1604_v30, 8.507059e+37 }
 0x61b   :  { %v1989_v43 = vpop.eup %1988 }
 0x61c   :  { %v1579_v44 = vadd.f32 1.0, %v1989_v43 }
 0x61d   :  { %v1991_v51 = vpop.eup %1990 }
 0x61e   :  { %v1993_v57 = vpop.eup %1992  ;;  %v1581_v25 = vmul.f32 %v1991_v51, %v1577_v17  ;;  %1994 = vrcp.f32 %v1579_v44  ;;  %vm1586_vm6 = vweird.f32 %v1991_v51  ;;  %v1621_v38 = vand.u32 2147483648, %v1579_v44 }
 0x61f   :  { %v1596_v60 = vmul.f32 %v1993_v57, %v1578_v21  ;;  %1996 = vtanh.f32 %v1565_v7  ;;  %vm1601_vm7 = vweird.f32 %v1993_v57  ;;  %vm1587_vm10 = vmor %vm1585_vm8, %vm1586_vm6  ;;  %vm1615_vm1 = vweird.f32 %v1579_v44 }
 0x620   :  { %v1582_v0 = vsub.f32 1.0, %v1581_v25  ;;  %vm1602_vm11 = vmor %vm1600_vm9, %vm1601_vm7  ;;  %v1619_v26 = vand.u32 2147483647, %v1579_v44  ;;  %v1622_v20 = vor.u32 1.1754944e-38, %v1621_v38 }
 0x621   :  { %v1597_v2 = vsub.f32 1.0, %v1596_v60 }
 0x622   :  { %v1583_v56 = vmul.f32 %v1991_v51, %v1582_v0  ;;  %vm1620_vm14 = vcmp.eq.f32.partialorder %v1619_v26, 8.507059e+37 }
 0x623   :  { %v1598_v61 = vmul.f32 %v1993_v57, %v1597_v2 }
 0x624   :  { %v1995_v19 = vpop.eup %1994  ;;  %v1584_v55 = vadd.f32 %v1991_v51, %v1583_v56 }
 0x625   :  { %v1599_v46 = vadd.f32 %v1993_v57, %v1598_v61  ;;  %v1611_v10 = vmul.f32 %v1995_v19, %v1579_v44  ;;  %v1997_v49 = vpop.eup %1996  ;;  %vm1616_vm0 = vweird.f32 %v1995_v19 }
 0x626   :  { %v1588_v52 = vsel %vm1587_vm10, %v1991_v51, %v1584_v55  ;;  %vm1617_vm2 = vmor %vm1615_vm1, %vm1616_vm0 }
 0x627   :  { %v1593_v59 = vsel %vm1590_vm12, %v1592_v15, %v1588_v52  ;;  %v1603_v29 = vsel %vm1602_vm11, %v1993_v57, %v1599_v46  ;;  %v1612_v32 = vsub.f32 1.0, %v1611_v10 }
 0x628   :  { %v1627_v34 = vmul.f32 %v1997_v49, %v1593_v59  ;;  %v1608_v1 = vsel %vm1605_vm13, %v1607_v45, %v1603_v29 }
 0x629   :  { %v1613_v12 = vmul.f32 %v1995_v19, %v1612_v32  ;;  %v1626_v48 = vmul.f32 %v1608_v1, %v2685_v42 }
 0x62b   :  { %v1628_v28 = vadd.f32 %v1627_v34, %v1626_v48  ;;  %v1614_v11 = vadd.f32 %v1995_v19, %v1613_v12 }
 0x62d   :  { %1998 = vtanh.f32 %v1628_v28  ;;  %v1618_v41 = vsel %vm1617_vm2, %v1995_v19, %v1614_v11 }
 0x62e   :  { %v1623_v13 = vsel %vm1620_vm14, %v1622_v20, %v1618_v41 }
 0x633   :  { %v1999_v5 = vpop.eup %1998 }
 0x634   :  { %v1630_v14 = vmul.f32 %v1999_v5, %v1623_v13 }
 0x636   :  { %v1637_v18 = vmul.f32 %v1635_v9, %v1630_v14 }
 0x638   :  { %1639 = vrot.lane.b32.xlu0 %v1637_v18, %s2031_s26 }
 0x6aa   :  { %v1640_v42 = vpop.permute.xlu0 %1639 }
 0x6ab   :  { %v1643_v58 = vsel %vm1642_vm15, %v1640_v42, 0.0 }
 0x6ac   :  { %1644 = vadd.xlane.f32.xlu1 %v1643_v58 }
 0x71f   :  { %v1645_v23 = vpop.xlane.xlu1 %1644 }
 0x720   :  { %v1650_v27 = vadd.f32 %v1855_v22, %v1645_v23 }
 0x722   :  { %1652 = vst.msk [vmem:[%s2699_s6] sm:$0x3] %vm1651_vm3, %v1650_v27 }
 0x723   :  { %1657 = vsyncpa [#allocation5], 1 }

</bundles_post_ra>
